<compile_context>
chip_gen: v6e
topology: v6e:2x2x1
jax: 0.10.0
libtpu: 0.0.40
codegen_flags: <defaults>
</compile_context>

<pallas_src>
import functools

import jax
import jax.numpy as jnp
from jax.experimental import pallas as pl
from jax.experimental.pallas import tpu as pltpu

LANE = 128


def _round_up(x, m):
    return ((x + m - 1) // m) * m


def _pad_to(x, shape):
    return jnp.pad(x, [(0, t - s) for s, t in zip(x.shape, shape)])


# ----------------------------------------------------------------------------
# Fused Pallas kernel: whole GCNNet forward pass in one grid step.
# ----------------------------------------------------------------------------
def fused_gcn_kernel(a_ref, x_ref, wconv_ref, bconv_ref, wlin_ref, blin_ref,
                     out_ref, *, num_classes):
    """
      a_ref     : (Np, Np)     bf16  normalized adjacency (zero-padded)
      x_ref     : (Np, Dp)     bf16  node features        (zero-padded)
      wconv_ref : (L, Dp, Dp)  bf16  per-layer GCN weights (zero-padded)
      bconv_ref : (L, 1, Dp)   f32   per-layer GCN biases  (zero-padded)
      wlin_ref  : (L, Dp, Cp)  bf16  per-layer chunks of the head weight
      blin_ref  : (1, Cp)      f32   head bias (zero-padded)
      out_ref   : (Np, Cp)     f32   log-probabilities (padded)
    """
    num_layers = wconv_ref.shape[0]
    a = a_ref[...]                                          # (Np, Np) bf16
    h = x_ref[...]                                          # (Np, Dp) bf16
    logits = blin_ref[...].astype(jnp.float32)              # (1, Cp), broadcasts

    for layer in range(num_layers):                         # static unroll
        # GCNConv: A_hat @ (h @ W) + b, then ReLU (dropout p=0 elided).
        xw = jnp.dot(h, wconv_ref[layer],
                     preferred_element_type=jnp.float32)     # (Np, Dp) f32
        agg = jnp.dot(a, xw.astype(a.dtype),
                      preferred_element_type=jnp.float32)    # (Np, Dp) f32
        h_f32 = jnp.maximum(agg + bconv_ref[layer], 0.0)     # ReLU
        h = h_f32.astype(a.dtype)                            # bf16 for next matmuls
        # This layer's slice of "concat(x_all) @ lin_w", accumulated directly.
        logits = logits + jnp.dot(h, wlin_ref[layer],
                                  preferred_element_type=jnp.float32)

    # Numerically stable log_softmax over the REAL classes only; padded class
    # lanes are masked out so they do not perturb the normalizer.
    logits = jnp.broadcast_to(logits, out_ref.shape)
    col = jax.lax.broadcasted_iota(jnp.int32, out_ref.shape, 1)
    logits = jnp.where(col < num_classes, logits, jnp.float32(-1e30))
    m = jnp.max(logits, axis=-1, keepdims=True)
    z = logits - m
    lse = jnp.log(jnp.sum(jnp.exp(z), axis=-1, keepdims=True))
    out_ref[...] = z - lse


def _fused_forward(a_p, x_p, wconv, bconv, wlin, blin, num_classes):
    n_pad = a_p.shape[0]
    c_pad = blin.shape[1]

    def full(shape):
        zeros = tuple(0 for _ in shape)
        return pl.BlockSpec(shape, lambda i, _z=zeros: _z)

    return pl.pallas_call(
        functools.partial(fused_gcn_kernel, num_classes=num_classes),
        out_shape=jax.ShapeDtypeStruct((n_pad, c_pad), jnp.float32),
        grid=(1,),
        in_specs=[full(a_p.shape), full(x_p.shape), full(wconv.shape),
                  full(bconv.shape), full(wlin.shape), full(blin.shape)],
        out_specs=full((n_pad, c_pad)),
        compiler_params=pltpu.CompilerParams(
            dimension_semantics=("arbitrary",)),
    )(a_p, x_p, wconv, bconv, wlin, blin)


# ----------------------------------------------------------------------------
# Glue: GCN normalization (dense A_hat) and parameter init
# ----------------------------------------------------------------------------
def build_normalized_adjacency(edge_index, num_nodes):
    """A_hat = D^{-1/2} (A + remaining self loops) D^{-1/2}  (PyG gcn_norm)."""
    src, dst = edge_index[0], edge_index[1]
    a = jnp.zeros((num_nodes, num_nodes), jnp.float32).at[dst, src].add(1.0)
    idx = jnp.arange(num_nodes)
    diag = a[idx, idx]
    # add_remaining_self_loops: only nodes without an existing self loop get one.
    a = a.at[idx, idx].set(jnp.where(diag > 0, diag, 1.0))
    deg = jnp.sum(a, axis=1)
    dinv = jnp.where(deg > 0, 1.0 / jnp.sqrt(deg), 0.0)
    return dinv[:, None] * a * dinv[None, :]


def glorot(key, shape):
    fan_in, fan_out = shape
    limit = jnp.sqrt(6.0 / (fan_in + fan_out))
    return jax.random.uniform(key, shape, jnp.float32, -limit, limit)


def init_params(key, input_dim, hidden_dim, label_dim, num_layers):
    params = {"conv_w": [], "conv_b": []}
    dims = [input_dim] + [hidden_dim] * num_layers
    for i in range(num_layers):
        key, k = jax.random.split(key)
        params["conv_w"].append(glorot(k, (dims[i], dims[i + 1])))
        params["conv_b"].append(jnp.zeros((1, dims[i + 1]), jnp.float32))
    key, k = jax.random.split(key)
    params["lin_w"] = glorot(k, (num_layers * hidden_dim, label_dim))
    params["lin_b"] = jnp.zeros((1, label_dim), jnp.float32)
    return params


@functools.partial(jax.jit, static_argnames=("num_layers", "label_dim"))
def gcnnet_forward(params, x, a_hat, num_layers, label_dim):
    n, f = x.shape
    hidden = params["conv_w"][0].shape[1]
    d_pad = max(_round_up(f, LANE), _round_up(hidden, LANE))
    c_pad = _round_up(label_dim, LANE)
    n_pad = _round_up(n, LANE)

    a_p = _pad_to(a_hat, (n_pad, n_pad)).astype(jnp.bfloat16)
    x_p = _pad_to(x, (n_pad, d_pad)).astype(jnp.bfloat16)

    wconv = jnp.stack(
        [_pad_to(w, (d_pad, d_pad)) for w in params["conv_w"]]
    ).astype(jnp.bfloat16)
    bconv = jnp.stack(
        [_pad_to(b, (1, d_pad)) for b in params["conv_b"]]
    ).astype(jnp.float32)
    # Split the torch-style (L*H, C) head weight into per-layer (H, C) chunks.
    wlin = jnp.stack(
        [_pad_to(params["lin_w"][l * hidden:(l + 1) * hidden, :], (d_pad, c_pad))
         for l in range(num_layers)]
    ).astype(jnp.bfloat16)
    blin = _pad_to(params["lin_b"], (1, c_pad)).astype(jnp.float32)

    out_p = _fused_forward(a_p, x_p, wconv, bconv, wlin, blin, label_dim)
    return out_p[:n, :label_dim]


# ----------------------------------------------------------------------------
if __name__ == "__main__":
    # Small synthetic problem: 16 nodes, input_dim=8, hidden_dim=32,
    # label_dim=4, num_layers=3.
    num_nodes = 16
    input_dim = 8
    hidden_dim = 32
    label_dim = 4
    num_layers = 3

    key = jax.random.PRNGKey(0)
    kx, ke, kp = jax.random.split(key, 3)

    x = jax.random.normal(kx, (num_nodes, input_dim), jnp.float32)

    # deterministic random undirected edge set
    num_edges = 24
    src = jax.random.randint(ke, (num_edges,), 0, num_nodes)
    dst = jax.random.randint(jax.random.fold_in(ke, 1), (num_edges,), 0, num_nodes)
    edge_index = jnp.stack(
        [jnp.concatenate([src, dst]), jnp.concatenate([dst, src])], axis=0
    ).astype(jnp.int32)

    a_hat = build_normalized_adjacency(edge_index, num_nodes)
    params = init_params(kp, input_dim, hidden_dim, label_dim, num_layers)

    out = gcnnet_forward(params, x, a_hat, num_layers, label_dim)
    out = jax.block_until_ready(out)

    assert out.shape == (num_nodes, label_dim)
    # rows of log_softmax should exponentiate-sum to 1
    assert jnp.allclose(jnp.sum(jnp.exp(out), axis=1), 1.0, atol=1e-4)
    print("KERNEL_OK")
</pallas_src>

<mosaic_0001>
module attributes {stable_mosaic.version = 11 : i64} {
  func.func @fused_gcn_kernel(%arg0: i32, %arg1: memref<128x128xbf16, #tpu.memory_space<vmem>>, %arg2: memref<128x128xbf16, #tpu.memory_space<vmem>>, %arg3: memref<3x128x128xbf16, #tpu.memory_space<vmem>>, %arg4: memref<3x1x128xf32, #tpu.memory_space<vmem>>, %arg5: memref<3x128x128xbf16, #tpu.memory_space<vmem>>, %arg6: memref<1x128xf32, #tpu.memory_space<vmem>>, %arg7: memref<128x128xf32, #tpu.memory_space<vmem>>) attributes {dimension_semantics = [#tpu.dimension_semantics<arbitrary>], iteration_bounds = array<i64: 1>, scalar_prefetch = 0 : i64, scratch_operands = 0 : i64, tpu.core_type = #tpu.core_type<tc>, window_params = [{pipeline_mode = #tpu.pipeline_mode<synchronous>, transform_indices = @transform_0, window_bounds = array<i64: 128, 128>}, {pipeline_mode = #tpu.pipeline_mode<synchronous>, transform_indices = @transform_1, window_bounds = array<i64: 128, 128>}, {pipeline_mode = #tpu.pipeline_mode<synchronous>, transform_indices = @transform_2, window_bounds = array<i64: 3, 128, 128>}, {pipeline_mode = #tpu.pipeline_mode<synchronous>, transform_indices = @transform_3, window_bounds = array<i64: 3, 1, 128>}, {pipeline_mode = #tpu.pipeline_mode<synchronous>, transform_indices = @transform_4, window_bounds = array<i64: 3, 128, 128>}, {pipeline_mode = #tpu.pipeline_mode<synchronous>, transform_indices = @transform_5, window_bounds = array<i64: 1, 128>}, {pipeline_mode = #tpu.pipeline_mode<synchronous>, transform_indices = @transform_6, window_bounds = array<i64: 128, 128>}]} {
    %c0 = arith.constant 0 : index
    %c0_0 = arith.constant 0 : index
    %0 = vector.load %arg1[%c0, %c0_0] : memref<128x128xbf16, #tpu.memory_space<vmem>>, vector<128x128xbf16>
    %c0_1 = arith.constant 0 : index
    %c0_2 = arith.constant 0 : index
    %1 = vector.load %arg2[%c0_1, %c0_2] : memref<128x128xbf16, #tpu.memory_space<vmem>>, vector<128x128xbf16>
    %c0_3 = arith.constant 0 : index
    %c0_4 = arith.constant 0 : index
    %2 = vector.load %arg6[%c0_3, %c0_4] : memref<1x128xf32, #tpu.memory_space<vmem>>, vector<1x128xf32>
    %c0_5 = arith.constant 0 : index
    %c0_6 = arith.constant 0 : index
    %c0_7 = arith.constant 0 : index
    %3 = vector.load %arg3[%c0_5, %c0_6, %c0_7] : memref<3x128x128xbf16, #tpu.memory_space<vmem>>, vector<1x128x128xbf16>
    %4 = vector.shape_cast %3 : vector<1x128x128xbf16> to vector<128x128xbf16>
    %cst = arith.constant dense<0.000000e+00> : vector<128x128xf32>
    %5 = tpu.matmul %1, %4, %cst {dimension_numbers = #tpu.dot_dimension_numbers<[1], [0], [0], [1], [0, 0, 1, 1], [], []>} : vector<128x128xbf16>, vector<128x128xbf16>, vector<128x128xf32> -> vector<128x128xf32>
    %6 = arith.truncf %5 : vector<128x128xf32> to vector<128x128xbf16>
    %cst_8 = arith.constant dense<0.000000e+00> : vector<128x128xf32>
    %7 = tpu.matmul %0, %6, %cst_8 {dimension_numbers = #tpu.dot_dimension_numbers<[1], [0], [0], [1], [0, 0, 1, 1], [], []>} : vector<128x128xbf16>, vector<128x128xbf16>, vector<128x128xf32> -> vector<128x128xf32>
    %c0_9 = arith.constant 0 : index
    %c0_10 = arith.constant 0 : index
    %c0_11 = arith.constant 0 : index
    %8 = vector.load %arg4[%c0_9, %c0_10, %c0_11] : memref<3x1x128xf32, #tpu.memory_space<vmem>>, vector<1x1x128xf32>
    %9 = vector.shape_cast %8 : vector<1x1x128xf32> to vector<1x128xf32>
    %10 = vector.broadcast %9 : vector<1x128xf32> to vector<128x128xf32>
    %11 = arith.addf %7, %10 : vector<128x128xf32>
    %cst_12 = arith.constant 0.000000e+00 : f32
    %12 = vector.broadcast %cst_12 : f32 to vector<128x128xf32>
    %13 = arith.maximumf %11, %12 : vector<128x128xf32>
    %14 = arith.truncf %13 : vector<128x128xf32> to vector<128x128xbf16>
    %c0_13 = arith.constant 0 : index
    %c0_14 = arith.constant 0 : index
    %c0_15 = arith.constant 0 : index
    %15 = vector.load %arg5[%c0_13, %c0_14, %c0_15] : memref<3x128x128xbf16, #tpu.memory_space<vmem>>, vector<1x128x128xbf16>
    %16 = vector.shape_cast %15 : vector<1x128x128xbf16> to vector<128x128xbf16>
    %cst_16 = arith.constant dense<0.000000e+00> : vector<128x128xf32>
    %17 = tpu.matmul %14, %16, %cst_16 {dimension_numbers = #tpu.dot_dimension_numbers<[1], [0], [0], [1], [0, 0, 1, 1], [], []>} : vector<128x128xbf16>, vector<128x128xbf16>, vector<128x128xf32> -> vector<128x128xf32>
    %18 = vector.broadcast %2 : vector<1x128xf32> to vector<128x128xf32>
    %19 = arith.addf %18, %17 : vector<128x128xf32>
    %c1 = arith.constant 1 : index
    %c0_17 = arith.constant 0 : index
    %c0_18 = arith.constant 0 : index
    %20 = vector.load %arg3[%c1, %c0_17, %c0_18] : memref<3x128x128xbf16, #tpu.memory_space<vmem>>, vector<1x128x128xbf16>
    %21 = vector.shape_cast %20 : vector<1x128x128xbf16> to vector<128x128xbf16>
    %cst_19 = arith.constant dense<0.000000e+00> : vector<128x128xf32>
    %22 = tpu.matmul %14, %21, %cst_19 {dimension_numbers = #tpu.dot_dimension_numbers<[1], [0], [0], [1], [0, 0, 1, 1], [], []>} : vector<128x128xbf16>, vector<128x128xbf16>, vector<128x128xf32> -> vector<128x128xf32>
    %23 = arith.truncf %22 : vector<128x128xf32> to vector<128x128xbf16>
    %cst_20 = arith.constant dense<0.000000e+00> : vector<128x128xf32>
    %24 = tpu.matmul %0, %23, %cst_20 {dimension_numbers = #tpu.dot_dimension_numbers<[1], [0], [0], [1], [0, 0, 1, 1], [], []>} : vector<128x128xbf16>, vector<128x128xbf16>, vector<128x128xf32> -> vector<128x128xf32>
    %c1_21 = arith.constant 1 : index
    %c0_22 = arith.constant 0 : index
    %c0_23 = arith.constant 0 : index
    %25 = vector.load %arg4[%c1_21, %c0_22, %c0_23] : memref<3x1x128xf32, #tpu.memory_space<vmem>>, vector<1x1x128xf32>
    %26 = vector.shape_cast %25 : vector<1x1x128xf32> to vector<1x128xf32>
    %27 = vector.broadcast %26 : vector<1x128xf32> to vector<128x128xf32>
    %28 = arith.addf %24, %27 : vector<128x128xf32>
    %cst_24 = arith.constant 0.000000e+00 : f32
    %29 = vector.broadcast %cst_24 : f32 to vector<128x128xf32>
    %30 = arith.maximumf %28, %29 : vector<128x128xf32>
    %31 = arith.truncf %30 : vector<128x128xf32> to vector<128x128xbf16>
    %c1_25 = arith.constant 1 : index
    %c0_26 = arith.constant 0 : index
    %c0_27 = arith.constant 0 : index
    %32 = vector.load %arg5[%c1_25, %c0_26, %c0_27] : memref<3x128x128xbf16, #tpu.memory_space<vmem>>, vector<1x128x128xbf16>
    %33 = vector.shape_cast %32 : vector<1x128x128xbf16> to vector<128x128xbf16>
    %cst_28 = arith.constant dense<0.000000e+00> : vector<128x128xf32>
    %34 = tpu.matmul %31, %33, %cst_28 {dimension_numbers = #tpu.dot_dimension_numbers<[1], [0], [0], [1], [0, 0, 1, 1], [], []>} : vector<128x128xbf16>, vector<128x128xbf16>, vector<128x128xf32> -> vector<128x128xf32>
    %35 = arith.addf %19, %34 : vector<128x128xf32>
    %c2 = arith.constant 2 : index
    %c0_29 = arith.constant 0 : index
    %c0_30 = arith.constant 0 : index
    %36 = vector.load %arg3[%c2, %c0_29, %c0_30] : memref<3x128x128xbf16, #tpu.memory_space<vmem>>, vector<1x128x128xbf16>
    %37 = vector.shape_cast %36 : vector<1x128x128xbf16> to vector<128x128xbf16>
    %cst_31 = arith.constant dense<0.000000e+00> : vector<128x128xf32>
    %38 = tpu.matmul %31, %37, %cst_31 {dimension_numbers = #tpu.dot_dimension_numbers<[1], [0], [0], [1], [0, 0, 1, 1], [], []>} : vector<128x128xbf16>, vector<128x128xbf16>, vector<128x128xf32> -> vector<128x128xf32>
    %39 = arith.truncf %38 : vector<128x128xf32> to vector<128x128xbf16>
    %cst_32 = arith.constant dense<0.000000e+00> : vector<128x128xf32>
    %40 = tpu.matmul %0, %39, %cst_32 {dimension_numbers = #tpu.dot_dimension_numbers<[1], [0], [0], [1], [0, 0, 1, 1], [], []>} : vector<128x128xbf16>, vector<128x128xbf16>, vector<128x128xf32> -> vector<128x128xf32>
    %c2_33 = arith.constant 2 : index
    %c0_34 = arith.constant 0 : index
    %c0_35 = arith.constant 0 : index
    %41 = vector.load %arg4[%c2_33, %c0_34, %c0_35] : memref<3x1x128xf32, #tpu.memory_space<vmem>>, vector<1x1x128xf32>
    %42 = vector.shape_cast %41 : vector<1x1x128xf32> to vector<1x128xf32>
    %43 = vector.broadcast %42 : vector<1x128xf32> to vector<128x128xf32>
    %44 = arith.addf %40, %43 : vector<128x128xf32>
    %cst_36 = arith.constant 0.000000e+00 : f32
    %45 = vector.broadcast %cst_36 : f32 to vector<128x128xf32>
    %46 = arith.maximumf %44, %45 : vector<128x128xf32>
    %47 = arith.truncf %46 : vector<128x128xf32> to vector<128x128xbf16>
    %c2_37 = arith.constant 2 : index
    %c0_38 = arith.constant 0 : index
    %c0_39 = arith.constant 0 : index
    %48 = vector.load %arg5[%c2_37, %c0_38, %c0_39] : memref<3x128x128xbf16, #tpu.memory_space<vmem>>, vector<1x128x128xbf16>
    %49 = vector.shape_cast %48 : vector<1x128x128xbf16> to vector<128x128xbf16>
    %cst_40 = arith.constant dense<0.000000e+00> : vector<128x128xf32>
    %50 = tpu.matmul %47, %49, %cst_40 {dimension_numbers = #tpu.dot_dimension_numbers<[1], [0], [0], [1], [0, 0, 1, 1], [], []>} : vector<128x128xbf16>, vector<128x128xbf16>, vector<128x128xf32> -> vector<128x128xf32>
    %51 = arith.addf %35, %50 : vector<128x128xf32>
    %52 = tpu.iota {dimensions = array<i32: 1>} : vector<128x128xi32>
    %c4_i32 = arith.constant 4 : i32
    %53 = vector.broadcast %c4_i32 : i32 to vector<128x128xi32>
    %54 = arith.cmpi slt, %52, %53 : vector<128x128xi32>
    %cst_41 = arith.constant -1.000000e+30 : f32
    %55 = vector.broadcast %cst_41 : f32 to vector<128x128xf32>
    %56 = arith.select %54, %51, %55 : vector<128x128xi1>, vector<128x128xf32>
    %cst_42 = arith.constant dense<0xFF800000> : vector<128xf32>
    %57 = vector.multi_reduction <maximumf>, %56, %cst_42 [1] : vector<128x128xf32> to vector<128xf32>
    %58 = vector.shape_cast %57 : vector<128xf32> to vector<128x1xf32>
    %59 = vector.broadcast %58 : vector<128x1xf32> to vector<128x128xf32>
    %60 = arith.subf %56, %59 : vector<128x128xf32>
    %61 = math.exp %60 : vector<128x128xf32>
    %cst_43 = arith.constant dense<0.000000e+00> : vector<128xf32>
    %62 = vector.multi_reduction <add>, %61, %cst_43 [1] : vector<128x128xf32> to vector<128xf32>
    %63 = vector.shape_cast %62 : vector<128xf32> to vector<128x1xf32>
    %64 = math.log %63 : vector<128x1xf32>
    %65 = vector.broadcast %64 : vector<128x1xf32> to vector<128x128xf32>
    %66 = arith.subf %60, %65 : vector<128x128xf32>
    %c0_44 = arith.constant 0 : index
    %c0_45 = arith.constant 0 : index
    %67 = vector.load %arg7[%c0_44, %c0_45] : memref<128x128xf32, #tpu.memory_space<vmem>>, vector<128x128xf32>
    tpu.vector_store %arg7[%c0_44, %c0_45], %66 {strides = array<i32>} : memref<128x128xf32, #tpu.memory_space<vmem>>, vector<128x128xf32>,
    return
  }
  func.func @transform_0(%arg0: i32) -> (i32, i32) {
    %c0_i32 = arith.constant 0 : i32
    %c0_i32_0 = arith.constant 0 : i32
    %c0_i32_1 = arith.constant 0 : i32
    return %c0_i32, %c0_i32_0 : i32, i32
  }
  func.func @transform_1(%arg0: i32) -> (i32, i32) {
    %c0_i32 = arith.constant 0 : i32
    %c0_i32_0 = arith.constant 0 : i32
    %c0_i32_1 = arith.constant 0 : i32
    return %c0_i32, %c0_i32_0 : i32, i32
  }
  func.func @transform_2(%arg0: i32) -> (i32, i32, i32) {
    %c0_i32 = arith.constant 0 : i32
    %c0_i32_0 = arith.constant 0 : i32
    %c0_i32_1 = arith.constant 0 : i32
    %c0_i32_2 = arith.constant 0 : i32
    return %c0_i32, %c0_i32_0, %c0_i32_1 : i32, i32, i32
  }
  func.func @transform_3(%arg0: i32) -> (i32, i32, i32) {
    %c0_i32 = arith.constant 0 : i32
    %c0_i32_0 = arith.constant 0 : i32
    %c0_i32_1 = arith.constant 0 : i32
    %c0_i32_2 = arith.constant 0 : i32
    return %c0_i32, %c0_i32_0, %c0_i32_1 : i32, i32, i32
  }
  func.func @transform_4(%arg0: i32) -> (i32, i32, i32) {
    %c0_i32 = arith.constant 0 : i32
    %c0_i32_0 = arith.constant 0 : i32
    %c0_i32_1 = arith.constant 0 : i32
    %c0_i32_2 = arith.constant 0 : i32
    return %c0_i32, %c0_i32_0, %c0_i32_1 : i32, i32, i32
  }
  func.func @transform_5(%arg0: i32) -> (i32, i32) {
    %c0_i32 = arith.constant 0 : i32
    %c0_i32_0 = arith.constant 0 : i32
    %c0_i32_1 = arith.constant 0 : i32
    return %c0_i32, %c0_i32_0 : i32, i32
  }
  func.func @transform_6(%arg0: i32) -> (i32, i32) {
    %c0_i32 = arith.constant 0 : i32
    %c0_i32_0 = arith.constant 0 : i32
    %c0_i32_1 = arith.constant 0 : i32
    return %c0_i32, %c0_i32_0 : i32, i32
  }
}

</mosaic_0001>

<bundles_post_ra>
// kernel: gcnnet_forward.1
= control target key start
LH: loop header
LB: loop body
LE: loop exit
PB: predicated region body
PF: predicated region fallthrough
CT: control target
= control target key end

     0   :  { %s3110_s2 = inlined_call_operand.vmem [shape: bf16[3,128,128], index: 2, kind: input, shape index: {}]   ;;  %s3111_s1 = inlined_call_operand.vmem [shape: bf16[128,128], index: 1, kind: input, shape index: {}]   ;;  %s3112_s0 = inlined_call_operand.vmem [shape: bf16[128,128], index: 0, kind: input, shape index: {}]   ;;  %s3113_s4 = inlined_call_operand.vmem [shape: bf16[3,128,128], index: 4, kind: input, shape index: {}]   ;;  %s3114_s3 = inlined_call_operand.vmem [shape: f32[3,1,128], index: 3, kind: input, shape index: {}]   ;;  %s3115_s5 = inlined_call_operand.vmem [shape: f32[1,128], index: 5, kind: input, shape index: {}]   ;;  %s3116_s6 = inlined_call_operand.vmem [shape: f32[128,128], index: 6, kind: output, shape index: {}]  }
   0x1   :  { %v2368_v0 = vld [vmem:[%s3110_s2 + $0x38] sm:$0xff]   ;;  %v2369_v1 = vld [vmem:[%s3110_s2 + $0x30] sm:$0xff]   ;;  %v2370_v2 = vld [vmem:[%s3110_s2 + $0x28] sm:$0xff]  }
   0x2   :  { %2064 = vmatprep.subr.bf16.mxu0 %v2368_v0  ;;  %v2371_v3 = vld [vmem:[%s3110_s2 + $0x20] sm:$0xff]   ;;  %v2372_v5 = vld [vmem:[%s3110_s2 + $0x18] sm:$0xff]   ;;  %v2373_v6 = vld [vmem:[%s3110_s2 + $0x10] sm:$0xff]  }
   0x3   :  { %2065 = vmatpush3.bf16.msra.mxu0 %v2368_v0  ;;  %v2376_v4 = vld [vmem:[%s3111_s1] sm:$0xff]   ;;  %v2374_v7 = vld [vmem:[%s3110_s2 + $0x8] sm:$0xff]   ;;  %v2378_v10 = vld [vmem:[%s3111_s1 + $0x10] sm:$0xff]  }
   0x4   :  { %2066 = vmatprep.subr.bf16.mxu0 %v2369_v1  ;;  %2080 = vmatprep.mubr.bf16.mxu0 %v2376_v4  ;;  %v2375_v8 = vld [vmem:[%s3110_s2] sm:$0xff]   ;;  %v2377_v9 = vld [vmem:[%s3111_s1 + $0x8] sm:$0xff]   ;;  %v2379_v11 = vld [vmem:[%s3111_s1 + $0x18] sm:$0xff]  }
   0x5   :  { %v2380_v12 = vld [vmem:[%s3111_s1 + $0x20] sm:$0xff]   ;;  %v2381_v13 = vld [vmem:[%s3111_s1 + $0x28] sm:$0xff]   ;;  %v2382_v14 = vld [vmem:[%s3111_s1 + $0x30] sm:$0xff]  }
   0x6   :  { %v2383_v15 = vld [vmem:[%s3111_s1 + $0x38] sm:$0xff]   ;;  %v2582_v16 = vld [vmem:[%s3112_s0] sm:$0xff]   ;;  %v2394_v18 = vld [vmem:[%s3113_s4 + $0x30] sm:$0xff]  }
   0x7   :  { %2067 = vmatpush3.bf16.msra.mxu0 %v2369_v1  ;;  %2112 = vmatprep.mubr.bf16.mxu1 %v2582_v16  ;;  %v2392_v17 = vld [vmem:[%s3113_s4 + $0x38] sm:$0xff]   ;;  %v2396_v19 = vld [vmem:[%s3113_s4 + $0x28] sm:$0xff]   ;;  %v2398_v20 = vld [vmem:[%s3113_s4 + $0x20] sm:$0xff]  }
   0x8   :  { %2068 = vmatprep.subr.bf16.mxu0 %v2370_v2  ;;  %v2400_v21 = vld [vmem:[%s3113_s4 + $0x18] sm:$0xff]   ;;  %v2606_v47 = vld [vmem:[%s3112_s0 + $0x8] sm:$0xff]   ;;  %v2611_v48 = vld [vmem:[%s3112_s0 + $0x10] sm:$0xff]  }
   0x9   :  { %v2393_v46 = vld [vmem:[%s3110_s2 + $0x78] sm:$0xff]   ;;  %v2395_v49 = vld [vmem:[%s3110_s2 + $0x70] sm:$0xff]   ;;  %v2397_v50 = vld [vmem:[%s3110_s2 + $0x68] sm:$0xff]  }
   0xa   :  { %v2624_v51 = vld [vmem:[%s3112_s0 + $0x18] sm:$0xff]   ;;  %v2629_v52 = vld [vmem:[%s3112_s0 + $0x20] sm:$0xff]   ;;  %v2642_v55 = vld [vmem:[%s3112_s0 + $0x28] sm:$0xff]  }
   0xb   :  { %2069 = vmatpush3.bf16.msra.mxu0 %v2370_v2  ;;  %v2399_v53 = vld [vmem:[%s3110_s2 + $0x60] sm:$0xff]   ;;  %v2401_v54 = vld [vmem:[%s3110_s2 + $0x58] sm:$0xff]   ;;  %v2647_v56 = vld [vmem:[%s3112_s0 + $0x30] sm:$0xff]  }
   0xc   :  { %2070 = vmatprep.subr.bf16.mxu0 %v2371_v3  ;;  %v2654_v57 = vld [vmem:[%s3112_s0 + $0x38] sm:$0xff]   ;;  %v2402_v58 = vld [vmem:[%s3113_s4 + $0x10] sm:$0xff]   ;;  %v2404_v60 = vld [vmem:[%s3113_s4 + $0x8] sm:$0xff]  }
   0xd   :  { %v2403_v59 = vld [vmem:[%s3110_s2 + $0x50] sm:$0xff]   ;;  %v2405_v61 = vld [vmem:[%s3110_s2 + $0x48] sm:$0xff]   ;;  %v2406_v62 = vld [vmem:[%s3113_s4] sm:$0xff]  }
   0xe   :  { %v2407_v63 = vld [vmem:[%s3110_s2 + $0x40] sm:$0xff]  }
   0xf   :  { %2071 = vmatpush3.bf16.msra.mxu0 %v2371_v3  ;;  %v1802_v2 = vld [vmem:[%s3114_s3] ss:$0 sm:$0xff] }
  0x10   :  { %2072 = vmatprep.subr.bf16.mxu0 %v2372_v5 }
  0x13   :  { %2073 = vmatpush3.bf16.msra.mxu0 %v2372_v5 }
  0x14   :  { %2074 = vmatprep.subr.bf16.mxu0 %v2373_v6 }
  0x17   :  { %2075 = vmatpush3.bf16.msra.mxu0 %v2373_v6 }
  0x18   :  { %2076 = vmatprep.subr.bf16.mxu0 %v2374_v7 }
  0x1b   :  { %2077 = vmatpush3.bf16.msra.mxu0 %v2374_v7 }
  0x1c   :  { %2078 = vmatprep.subr.bf16.mxu0 %v2375_v8 }
  0x1f   :  { %2079 = vmatpush3.bf16.msra.mxu0 %v2375_v8 }
  0x20   :  { %2128 = vmatprep.subr.bf16.mxu0 %v2392_v17 }
  0x22   :  { %2081 = vmatmul.mubr.bf16.vlgmr.msra.gmra.mxu0 %v2377_v9 }
  0x23   :  { %2084 = vmatprep.mubr.bf16.mxu0 %v2378_v10  ;;  %2129 = vmatpush3.bf16.msra.mxu0 %v2392_v17 }
  0x24   :  { %2130 = vmatprep.subr.bf16.mxu0 %v2394_v18 }
  0x27   :  { %2131 = vmatpush3.bf16.msra.mxu0 %v2394_v18 }
  0x28   :  { %2132 = vmatprep.subr.bf16.mxu0 %v2396_v19 }
  0x2a   :  { %2085 = vmatmul.mubr.bf16.gmra.mxu0 %v2379_v11 }
  0x2b   :  { %2088 = vmatprep.mubr.bf16.mxu0 %v2380_v12  ;;  %2133 = vmatpush3.bf16.msra.mxu0 %v2396_v19 }
  0x2c   :  { %2134 = vmatprep.subr.bf16.mxu0 %v2398_v20 }
  0x2f   :  { %2135 = vmatpush3.bf16.msra.mxu0 %v2398_v20 }
  0x30   :  { %2136 = vmatprep.subr.bf16.mxu0 %v2400_v21 }
  0x32   :  { %2089 = vmatmul.mubr.bf16.gmra.mxu0 %v2381_v13 }
  0x33   :  { %2092 = vmatprep.mubr.bf16.mxu0 %v2382_v14  ;;  %2137 = vmatpush3.bf16.msra.mxu0 %v2400_v21 }
  0x34   :  { %2138 = vmatprep.subr.bf16.mxu0 %v2402_v58 }
  0x37   :  { %2139 = vmatpush3.bf16.msra.mxu0 %v2402_v58 }
  0x38   :  { %2140 = vmatprep.subr.bf16.mxu0 %v2404_v60 }
  0x3a   :  { %2093 = vmatmul.mubr.bf16.gmra.mxu0 %v2383_v15 }
  0x3b   :  { %2141 = vmatpush3.bf16.msra.mxu0 %v2404_v60 }
  0x3c   :  { %2142 = vmatprep.subr.bf16.mxu0 %v2406_v62 }
  0x3f   :  { %2143 = vmatpush3.bf16.msra.mxu0 %v2406_v62 }
  0xe2   :  { %v2082_v22 = vpop.f32.mrf.mxu0 }
  0xe4   :  { %v203_v23 = vpop.f32.mrf.mxu0 }
  0xe6   :  { %v2083_v24 = vpop.f32.mrf.mxu0 }
  0xe7   :  { %v267_v44 = vpack.c.bf16 %v2083_v24, %v2082_v22 }
  0xe8   :  { %v206_v25 = vpop.f32.mrf.mxu0 }
  0xe9   :  { %v266_v45 = vpack.c.bf16 %v206_v25, %v203_v23 }
  0xea   :  { %v2086_v26 = vpop.f32.mrf.mxu0 }
  0xec   :  { %v219_v27 = vpop.f32.mrf.mxu0 }
  0xee   :  { %v2087_v28 = vpop.f32.mrf.mxu0 }
  0xef   :  { %v269_v42 = vpack.c.bf16 %v2087_v28, %v2086_v26 }
  0xf0   :  { %v222_v29 = vpop.f32.mrf.mxu0 }
  0xf1   :  { %v268_v43 = vpack.c.bf16 %v222_v29, %v219_v27 }
  0xf2   :  { %v2090_v30 = vpop.f32.mrf.mxu0 }
  0xf4   :  { %v235_v31 = vpop.f32.mrf.mxu0 }
  0xf6   :  { %v2091_v32 = vpop.f32.mrf.mxu0 }
  0xf7   :  { %v271_v40 = vpack.c.bf16 %v2091_v32, %v2090_v30 }
  0xf8   :  { %v238_v33 = vpop.f32.mrf.mxu0 }
  0xf9   :  { %v270_v41 = vpack.c.bf16 %v238_v33, %v235_v31 }
  0xfa   :  { %v2094_v34 = vpop.f32.mrf.mxu0 }
  0xfc   :  { %v251_v35 = vpop.f32.mrf.mxu0 }
  0xfe   :  { %v2095_v36 = vpop.f32.mrf.mxu0 }
  0xff   :  { %v273_v37 = vpack.c.bf16 %v2095_v36, %v2094_v34 }
 0x100   :  { %v254_v38 = vpop.f32.mrf.mxu0 }
 0x101   :  { %v272_v39 = vpack.c.bf16 %v254_v38, %v251_v35  ;;  %2096 = vmatprep.subr.bf16.mxu1 %v273_v37 }
 0x102   :  { %2097 = vmatpush3.bf16.msra.mxu1 %v273_v37 }
 0x103   :  { %2098 = vmatprep.subr.bf16.mxu1 %v272_v39 }
 0x106   :  { %2099 = vmatpush3.bf16.msra.mxu1 %v272_v39 }
 0x107   :  { %2100 = vmatprep.subr.bf16.mxu1 %v271_v40 }
 0x10a   :  { %2101 = vmatpush3.bf16.msra.mxu1 %v271_v40 }
 0x10b   :  { %2102 = vmatprep.subr.bf16.mxu1 %v270_v41 }
 0x10e   :  { %2103 = vmatpush3.bf16.msra.mxu1 %v270_v41 }
 0x10f   :  { %2104 = vmatprep.subr.bf16.mxu1 %v269_v42 }
 0x112   :  { %2105 = vmatpush3.bf16.msra.mxu1 %v269_v42 }
 0x113   :  { %2106 = vmatprep.subr.bf16.mxu1 %v268_v43 }
 0x116   :  { %2107 = vmatpush3.bf16.msra.mxu1 %v268_v43 }
 0x117   :  { %2108 = vmatprep.subr.bf16.mxu1 %v267_v44 }
 0x11a   :  { %2109 = vmatpush3.bf16.msra.mxu1 %v267_v44 }
 0x11b   :  { %2110 = vmatprep.subr.bf16.mxu1 %v266_v45 }
 0x11e   :  { %2111 = vmatpush3.bf16.msra.mxu1 %v266_v45 }
 0x11f   :  { %2160 = vmatprep.subr.bf16.mxu1 %v2393_v46 }
 0x121   :  { %2113 = vmatmul.mubr.bf16.vlgmr.msra.gmra.mxu1 %v2606_v47 }
 0x122   :  { %2116 = vmatprep.mubr.bf16.mxu1 %v2611_v48  ;;  %2161 = vmatpush3.bf16.msra.mxu1 %v2393_v46 }
 0x123   :  { %2162 = vmatprep.subr.bf16.mxu1 %v2395_v49 }
 0x126   :  { %2163 = vmatpush3.bf16.msra.mxu1 %v2395_v49 }
 0x127   :  { %2164 = vmatprep.subr.bf16.mxu1 %v2397_v50 }
 0x129   :  { %2117 = vmatmul.mubr.bf16.gmra.mxu1 %v2624_v51 }
 0x12a   :  { %2120 = vmatprep.mubr.bf16.mxu1 %v2629_v52  ;;  %2165 = vmatpush3.bf16.msra.mxu1 %v2397_v50 }
 0x12b   :  { %2166 = vmatprep.subr.bf16.mxu1 %v2399_v53 }
 0x12e   :  { %2167 = vmatpush3.bf16.msra.mxu1 %v2399_v53 }
 0x12f   :  { %2168 = vmatprep.subr.bf16.mxu1 %v2401_v54 }
 0x131   :  { %2121 = vmatmul.mubr.bf16.gmra.mxu1 %v2642_v55 }
 0x132   :  { %2124 = vmatprep.mubr.bf16.mxu1 %v2647_v56  ;;  %2169 = vmatpush3.bf16.msra.mxu1 %v2401_v54 }
 0x133   :  { %2170 = vmatprep.subr.bf16.mxu1 %v2403_v59 }
 0x136   :  { %2171 = vmatpush3.bf16.msra.mxu1 %v2403_v59 }
 0x137   :  { %2172 = vmatprep.subr.bf16.mxu1 %v2405_v61 }
 0x139   :  { %2125 = vmatmul.mubr.bf16.gmra.mxu1 %v2654_v57 }
 0x13a   :  { %2173 = vmatpush3.bf16.msra.mxu1 %v2405_v61 }
 0x13b   :  { %2174 = vmatprep.subr.bf16.mxu1 %v2407_v63 }
 0x13e   :  { %2175 = vmatpush3.bf16.msra.mxu1 %v2407_v63 }
 0x1e1   :  { %v2114_v0 = vpop.f32.mrf.mxu1 }
 0x1e2   :  { %v372_v6 = vadd.f32 %v2114_v0, %v1802_v2 }
 0x1e3   :  { %v363_v1 = vpop.f32.mrf.mxu1 }
 0x1e4   :  { %v364_v4 = vadd.f32 %v1802_v2, %v363_v1  ;;  %v428_v13 = vmax.f32 %v372_v6, 0.0  ;;  %v2408_v1 = vld [vmem:[%s3113_s4 + $0x78] sm:$0xff]  }
 0x1e5   :  { %v2115_v3 = vpop.f32.mrf.mxu1  ;;  %2224 = vmatprep.subr.bf16.mxu1 %v2408_v1 }
 0x1e6   :  { %v375_v5 = vadd.f32 %v2115_v3, %v1802_v2  ;;  %v426_v11 = vmax.f32 %v364_v4, 0.0  ;;  %v2412_v3 = vld [vmem:[%s3113_s4 + $0x68] sm:$0xff]   ;;  %v2414_v4 = vld [vmem:[%s3113_s4 + $0x60] sm:$0xff]  }
 0x1e7   :  { %v366_v7 = vpop.f32.mrf.mxu1 }
 0x1e8   :  { %v367_v8 = vadd.f32 %v1802_v2, %v366_v7  ;;  %v429_v9 = vmax.f32 %v375_v5, 0.0  ;;  %v2416_v5 = vld [vmem:[%s3113_s4 + $0x58] sm:$0xff]  }
 0x1e9   :  { %v2118_v10 = vpop.f32.mrf.mxu1 }
 0x1ea   :  { %v427_v12 = vmax.f32 %v367_v8, 0.0  ;;  %v443_v17 = vpack.c.bf16 %v429_v9, %v428_v13  ;;  %v388_v21 = vadd.f32 %v2118_v10, %v1802_v2 }
 0x1eb   :  { %v379_v14 = vpop.f32.mrf.mxu1 }
 0x1ec   :  { %v442_v15 = vpack.c.bf16 %v427_v12, %v426_v11  ;;  %v380_v19 = vadd.f32 %v1802_v2, %v379_v14  ;;  %v432_v28 = vmax.f32 %v388_v21, 0.0 }
 0x1ed   :  { %v2119_v18 = vpop.f32.mrf.mxu1 }
 0x1ee   :  { %v391_v20 = vadd.f32 %v2119_v18, %v1802_v2  ;;  %2144 = vmatprep.mubr.bf16.mxu0 %v442_v15  ;;  %2176 = vmatprep.mubr.bf16.mxu1 %v442_v15  ;;  %v430_v26 = vmax.f32 %v380_v19, 0.0 }
 0x1ef   :  { %v382_v22 = vpop.f32.mrf.mxu1  ;;  %2145 = vmatmul.mubr.bf16.vlgmr.msra.gmra.mxu0 %v443_v17  ;;  %2177 = vmatmul.mubr.bf16.vlgmr.msra.gmra.mxu1 %v443_v17 }
 0x1f0   :  { %v383_v23 = vadd.f32 %v1802_v2, %v382_v22  ;;  %v433_v24 = vmax.f32 %v391_v20, 0.0  ;;  %2225 = vmatpush3.bf16.msra.mxu1 %v2408_v1 }
 0x1f1   :  { %v2122_v25 = vpop.f32.mrf.mxu1 }
 0x1f2   :  { %v431_v27 = vmax.f32 %v383_v23, 0.0  ;;  %v445_v31 = vpack.c.bf16 %v433_v24, %v432_v28  ;;  %v404_v35 = vadd.f32 %v2122_v25, %v1802_v2 }
 0x1f3   :  { %v395_v29 = vpop.f32.mrf.mxu1 }
 0x1f4   :  { %v444_v30 = vpack.c.bf16 %v431_v27, %v430_v26  ;;  %v396_v33 = vadd.f32 %v1802_v2, %v395_v29  ;;  %v436_v42 = vmax.f32 %v404_v35, 0.0  ;;  %v2417_v35 = vld [vmem:[%s3110_s2 + $0x98] sm:$0xff]  }
 0x1f5   :  { %v2123_v32 = vpop.f32.mrf.mxu1 }
 0x1f6   :  { %v407_v34 = vadd.f32 %v2123_v32, %v1802_v2  ;;  %2148 = vmatprep.mubr.bf16.mxu0 %v444_v30  ;;  %2180 = vmatprep.mubr.bf16.mxu1 %v444_v30  ;;  %v434_v40 = vmax.f32 %v396_v33, 0.0  ;;  %v2411_v32 = vld [vmem:[%s3110_s2 + $0xb0] sm:$0xff]   ;;  %v2413_v33 = vld [vmem:[%s3110_s2 + $0xa8] sm:$0xff]  }
 0x1f7   :  { %v398_v36 = vpop.f32.mrf.mxu1  ;;  %2149 = vmatmul.mubr.bf16.gmra.mxu0 %v445_v31  ;;  %2181 = vmatmul.mubr.bf16.gmra.mxu1 %v445_v31  ;;  %v2409_v31 = vld [vmem:[%s3110_s2 + $0xb8] sm:$0xff]  }
 0x1f8   :  { %v399_v37 = vadd.f32 %v1802_v2, %v398_v36  ;;  %v437_v38 = vmax.f32 %v407_v34, 0.0  ;;  %v2415_v34 = vld [vmem:[%s3110_s2 + $0xa0] sm:$0xff]   ;;  %v2418_v36 = vld [vmem:[%s3113_s4 + $0x50] sm:$0xff]  }
 0x1f9   :  { %v2126_v39 = vpop.f32.mrf.mxu1 }
 0x1fa   :  { %v435_v41 = vmax.f32 %v399_v37, 0.0  ;;  %v447_v45 = vpack.c.bf16 %v437_v38, %v436_v42  ;;  %v420_v53 = vadd.f32 %v2126_v39, %v1802_v2  ;;  %v2419_v37 = vld [vmem:[%s3110_s2 + $0x90] sm:$0xff]   ;;  %v2420_v38 = vld [vmem:[%s3113_s4 + $0x48] sm:$0xff]  }
 0x1fb   :  { %v411_v43 = vpop.f32.mrf.mxu1  ;;  %v2421_v39 = vld [vmem:[%s3110_s2 + $0x88] sm:$0xff]  }
 0x1fc   :  { %v446_v44 = vpack.c.bf16 %v435_v41, %v434_v40  ;;  %v412_v49 = vadd.f32 %v1802_v2, %v411_v43  ;;  %v440_v62 = vmax.f32 %v420_v53, 0.0  ;;  %v2422_v40 = vld [vmem:[%s3113_s4 + $0x40] sm:$0xff]  }
 0x1fd   :  { %v2127_v46 = vpop.f32.mrf.mxu1  ;;  %v2423_v41 = vld [vmem:[%s3110_s2 + $0x80] sm:$0xff]  }
 0x1fe   :  { %v423_v50 = vadd.f32 %v2127_v46, %v1802_v2  ;;  %2152 = vmatprep.mubr.bf16.mxu0 %v446_v44  ;;  %2184 = vmatprep.mubr.bf16.mxu1 %v446_v44  ;;  %v438_v60 = vmax.f32 %v412_v49, 0.0 }
 0x1ff   :  { %v414_v54 = vpop.f32.mrf.mxu1  ;;  %2153 = vmatmul.mubr.bf16.gmra.mxu0 %v447_v45  ;;  %2185 = vmatmul.mubr.bf16.gmra.mxu1 %v447_v45 }
 0x200   :  { %v415_v58 = vadd.f32 %v1802_v2, %v414_v54  ;;  %v441_v59 = vmax.f32 %v423_v50, 0.0  ;;  %v2410_v2 = vld [vmem:[%s3113_s4 + $0x70] sm:$0xff]  }
 0x201   :  { %2226 = vmatprep.subr.bf16.mxu1 %v2410_v2 }
 0x202   :  { %v439_v61 = vmax.f32 %v415_v58, 0.0  ;;  %v449_v0 = vpack.c.bf16 %v441_v59, %v440_v62  ;;  %2227 = vmatpush3.bf16.msra.mxu1 %v2410_v2 }
 0x203   :  { %2228 = vmatprep.subr.bf16.mxu1 %v2412_v3 }
 0x204   :  { %v448_v63 = vpack.c.bf16 %v439_v61, %v438_v60 }
 0x206   :  { %2156 = vmatprep.mubr.bf16.mxu0 %v448_v63  ;;  %2188 = vmatprep.mubr.bf16.mxu1 %v448_v63 }
 0x207   :  { %2157 = vmatmul.mubr.bf16.gmra.mxu0 %v449_v0  ;;  %2189 = vmatmul.mubr.bf16.gmra.mxu1 %v449_v0 }
 0x208   :  { %2208 = vmatprep.mubr.bf16.mxu0 %v2582_v16  ;;  %2229 = vmatpush3.bf16.msra.mxu1 %v2412_v3  ;;  %v1845_v3 = vld [vmem:[%s3114_s3 + $0x1] ss:$0 sm:$0xff] }
 0x209   :  { %2230 = vmatprep.subr.bf16.mxu1 %v2414_v4 }
 0x20c   :  { %2231 = vmatpush3.bf16.msra.mxu1 %v2414_v4 }
 0x20d   :  { %2232 = vmatprep.subr.bf16.mxu1 %v2416_v5 }
 0x210   :  { %2233 = vmatpush3.bf16.msra.mxu1 %v2416_v5 }
 0x211   :  { %2234 = vmatprep.subr.bf16.mxu1 %v2418_v36 }
 0x214   :  { %2235 = vmatpush3.bf16.msra.mxu1 %v2418_v36 }
 0x215   :  { %2236 = vmatprep.subr.bf16.mxu1 %v2420_v38 }
 0x218   :  { %2237 = vmatpush3.bf16.msra.mxu1 %v2420_v38 }
 0x219   :  { %2238 = vmatprep.subr.bf16.mxu1 %v2422_v40 }
 0x21c   :  { %2239 = vmatpush3.bf16.msra.mxu1 %v2422_v40 }
 0x2af   :  { %v2178_v6 = vpop.f32.mrf.mxu1  ;;  %v2734_v42 = vpop.f32.mrf.mxu0 }
 0x2b1   :  { %v732_v7 = vpop.f32.mrf.mxu1  ;;  %v2736_v43 = vpop.f32.mrf.mxu0 }
 0x2b3   :  { %v2179_v8 = vpop.f32.mrf.mxu1  ;;  %v2738_v44 = vpop.f32.mrf.mxu0 }
 0x2b4   :  { %v796_v29 = vpack.c.bf16 %v2179_v8, %v2178_v6 }
 0x2b5   :  { %v735_v9 = vpop.f32.mrf.mxu1  ;;  %v2740_v45 = vpop.f32.mrf.mxu0 }
 0x2b6   :  { %v795_v30 = vpack.c.bf16 %v735_v9, %v732_v7 }
 0x2b7   :  { %v2182_v10 = vpop.f32.mrf.mxu1  ;;  %v2742_v46 = vpop.f32.mrf.mxu0 }
 0x2b9   :  { %v748_v11 = vpop.f32.mrf.mxu1  ;;  %v2744_v49 = vpop.f32.mrf.mxu0 }
 0x2bb   :  { %v2183_v12 = vpop.f32.mrf.mxu1  ;;  %v2746_v50 = vpop.f32.mrf.mxu0 }
 0x2bc   :  { %v798_v27 = vpack.c.bf16 %v2183_v12, %v2182_v10 }
 0x2bd   :  { %v751_v13 = vpop.f32.mrf.mxu1  ;;  %v2748_v53 = vpop.f32.mrf.mxu0 }
 0x2be   :  { %v797_v28 = vpack.c.bf16 %v751_v13, %v748_v11 }
 0x2bf   :  { %v2186_v14 = vpop.f32.mrf.mxu1  ;;  %v2750_v54 = vpop.f32.mrf.mxu0 }
 0x2c1   :  { %v764_v15 = vpop.f32.mrf.mxu1  ;;  %v2752_v58 = vpop.f32.mrf.mxu0 }
 0x2c3   :  { %v2187_v17 = vpop.f32.mrf.mxu1  ;;  %v2754_v59 = vpop.f32.mrf.mxu0 }
 0x2c4   :  { %v800_v25 = vpack.c.bf16 %v2187_v17, %v2186_v14 }
 0x2c5   :  { %v767_v18 = vpop.f32.mrf.mxu1  ;;  %v2756_v60 = vpop.f32.mrf.mxu0 }
 0x2c6   :  { %v799_v26 = vpack.c.bf16 %v767_v18, %v764_v15 }
 0x2c7   :  { %v2190_v19 = vpop.f32.mrf.mxu1  ;;  %v2758_v61 = vpop.f32.mrf.mxu0 }
 0x2c9   :  { %v780_v20 = vpop.f32.mrf.mxu1  ;;  %v2760_v62 = vpop.f32.mrf.mxu0 }
 0x2cb   :  { %v2191_v21 = vpop.f32.mrf.mxu1  ;;  %v2762_v63 = vpop.f32.mrf.mxu0 }
 0x2cc   :  { %v802_v22 = vpack.c.bf16 %v2191_v21, %v2190_v19 }
 0x2cd   :  { %v783_v23 = vpop.f32.mrf.mxu1  ;;  %v2764_v0 = vpop.f32.mrf.mxu0 }
 0x2ce   :  { %v801_v24 = vpack.c.bf16 %v783_v23, %v780_v20  ;;  %2192 = vmatprep.subr.bf16.mxu0 %v802_v22 }
 0x2cf   :  { %2193 = vmatpush3.bf16.msra.mxu0 %v802_v22 }
 0x2d0   :  { %2194 = vmatprep.subr.bf16.mxu0 %v801_v24 }
 0x2d3   :  { %2195 = vmatpush3.bf16.msra.mxu0 %v801_v24 }
 0x2d4   :  { %2196 = vmatprep.subr.bf16.mxu0 %v800_v25 }
 0x2d7   :  { %2197 = vmatpush3.bf16.msra.mxu0 %v800_v25 }
 0x2d8   :  { %2198 = vmatprep.subr.bf16.mxu0 %v799_v26 }
 0x2db   :  { %2199 = vmatpush3.bf16.msra.mxu0 %v799_v26 }
 0x2dc   :  { %2200 = vmatprep.subr.bf16.mxu0 %v798_v27 }
 0x2df   :  { %2201 = vmatpush3.bf16.msra.mxu0 %v798_v27 }
 0x2e0   :  { %2202 = vmatprep.subr.bf16.mxu0 %v797_v28 }
 0x2e3   :  { %2203 = vmatpush3.bf16.msra.mxu0 %v797_v28 }
 0x2e4   :  { %2204 = vmatprep.subr.bf16.mxu0 %v796_v29 }
 0x2e7   :  { %2205 = vmatpush3.bf16.msra.mxu0 %v796_v29 }
 0x2e8   :  { %2206 = vmatprep.subr.bf16.mxu0 %v795_v30 }
 0x2eb   :  { %2207 = vmatpush3.bf16.msra.mxu0 %v795_v30 }
 0x2ec   :  { %2256 = vmatprep.subr.bf16.mxu0 %v2409_v31 }
 0x2ee   :  { %2209 = vmatmul.mubr.bf16.vlgmr.msra.gmra.mxu0 %v2606_v47 }
 0x2ef   :  { %2212 = vmatprep.mubr.bf16.mxu0 %v2611_v48  ;;  %2257 = vmatpush3.bf16.msra.mxu0 %v2409_v31 }
 0x2f0   :  { %2258 = vmatprep.subr.bf16.mxu0 %v2411_v32 }
 0x2f3   :  { %2259 = vmatpush3.bf16.msra.mxu0 %v2411_v32 }
 0x2f4   :  { %2260 = vmatprep.subr.bf16.mxu0 %v2413_v33 }
 0x2f6   :  { %2213 = vmatmul.mubr.bf16.gmra.mxu0 %v2624_v51 }
 0x2f7   :  { %2216 = vmatprep.mubr.bf16.mxu0 %v2629_v52  ;;  %2261 = vmatpush3.bf16.msra.mxu0 %v2413_v33 }
 0x2f8   :  { %2262 = vmatprep.subr.bf16.mxu0 %v2415_v34 }
 0x2fb   :  { %2263 = vmatpush3.bf16.msra.mxu0 %v2415_v34 }
 0x2fc   :  { %2264 = vmatprep.subr.bf16.mxu0 %v2417_v35 }
 0x2fe   :  { %2217 = vmatmul.mubr.bf16.gmra.mxu0 %v2642_v55 }
 0x2ff   :  { %2220 = vmatprep.mubr.bf16.mxu0 %v2647_v56  ;;  %2265 = vmatpush3.bf16.msra.mxu0 %v2417_v35 }
 0x300   :  { %2266 = vmatprep.subr.bf16.mxu0 %v2419_v37 }
 0x303   :  { %2267 = vmatpush3.bf16.msra.mxu0 %v2419_v37 }
 0x304   :  { %2268 = vmatprep.subr.bf16.mxu0 %v2421_v39 }
 0x306   :  { %2221 = vmatmul.mubr.bf16.gmra.mxu0 %v2654_v57 }
 0x307   :  { %2269 = vmatpush3.bf16.msra.mxu0 %v2421_v39 }
 0x308   :  { %2270 = vmatprep.subr.bf16.mxu0 %v2423_v41 }
 0x30b   :  { %2271 = vmatpush3.bf16.msra.mxu0 %v2423_v41 }
 0x3ae   :  { %v2210_v1 = vpop.f32.mrf.mxu0 }
 0x3af   :  { %v854_v7 = vadd.f32 %v2210_v1, %v1845_v3 }
 0x3b0   :  { %v845_v2 = vpop.f32.mrf.mxu0 }
 0x3b1   :  { %v846_v5 = vadd.f32 %v1845_v3, %v845_v2  ;;  %v910_v14 = vmax.f32 %v854_v7, 0.0 }
 0x3b2   :  { %v2211_v4 = vpop.f32.mrf.mxu0 }
 0x3b3   :  { %v857_v6 = vadd.f32 %v2211_v4, %v1845_v3  ;;  %v908_v12 = vmax.f32 %v846_v5, 0.0 }
 0x3b4   :  { %v848_v8 = vpop.f32.mrf.mxu0 }
 0x3b5   :  { %v849_v9 = vadd.f32 %v1845_v3, %v848_v8  ;;  %v911_v10 = vmax.f32 %v857_v6, 0.0 }
 0x3b6   :  { %v2214_v11 = vpop.f32.mrf.mxu0 }
 0x3b7   :  { %v909_v13 = vmax.f32 %v849_v9, 0.0  ;;  %v925_v18 = vpack.c.bf16 %v911_v10, %v910_v14  ;;  %v870_v22 = vadd.f32 %v2214_v11, %v1845_v3 }
 0x3b8   :  { %v861_v15 = vpop.f32.mrf.mxu0 }
 0x3b9   :  { %v924_v17 = vpack.c.bf16 %v909_v13, %v908_v12  ;;  %v862_v20 = vadd.f32 %v1845_v3, %v861_v15  ;;  %v914_v29 = vmax.f32 %v870_v22, 0.0  ;;  %v2800_v22 = vld [vmem:[%s3113_s4 + $0x98] sm:$0xff]  }
 0x3ba   :  { %v2215_v19 = vpop.f32.mrf.mxu0 }
 0x3bb   :  { %v873_v21 = vadd.f32 %v2215_v19, %v1845_v3  ;;  %2240 = vmatprep.mubr.bf16.mxu1 %v924_v17  ;;  %2272 = vmatprep.mubr.bf16.mxu0 %v924_v17  ;;  %v912_v27 = vmax.f32 %v862_v20, 0.0  ;;  %v2773_v20 = vld [vmem:[%s3113_s4 + $0xb8] sm:$0xff]  }
 0x3bc   :  { %v864_v23 = vpop.f32.mrf.mxu0  ;;  %2241 = vmatmul.mubr.bf16.vlgmr.msra.gmra.mxu1 %v925_v18  ;;  %2273 = vmatmul.mubr.bf16.vlgmr.msra.gmra.mxu0 %v925_v18 }
 0x3bd   :  { %v865_v24 = vadd.f32 %v1845_v3, %v864_v23  ;;  %v915_v25 = vmax.f32 %v873_v21, 0.0  ;;  %2320 = vmatprep.subr.bf16.mxu0 %v2773_v20  ;;  %v2793_v21 = vld [vmem:[%s3113_s4 + $0xa0] sm:$0xff]  }
 0x3be   :  { %v2218_v26 = vpop.f32.mrf.mxu0  ;;  %2321 = vmatpush3.bf16.msra.mxu0 %v2773_v20  ;;  %v2808_v23 = vld [vmem:[%s3115_s5] ss:$0 sm:$0xff] }
 0x3bf   :  { %v913_v28 = vmax.f32 %v865_v24, 0.0  ;;  %v927_v32 = vpack.c.bf16 %v915_v25, %v914_v29  ;;  %v886_v36 = vadd.f32 %v2218_v26, %v1845_v3  ;;  %v619_v24 = vadd.f32 %v2734_v42, %v2808_v23 }
 0x3c0   :  { %v877_v30 = vpop.f32.mrf.mxu0  ;;  %v618_v42 = vadd.f32 %v2808_v23, %v2740_v45  ;;  %v624_v45 = vadd.f32 %v2746_v50, %v2808_v23  ;;  %v625_v50 = vadd.f32 %v2808_v23, %v2752_v58  ;;  %v631_v58 = vadd.f32 %v2758_v61, %v2808_v23 }
 0x3c1   :  { %v926_v31 = vpack.c.bf16 %v913_v28, %v912_v27  ;;  %v878_v34 = vadd.f32 %v1845_v3, %v877_v30  ;;  %v918_v2 = vmax.f32 %v886_v36, 0.0  ;;  %v617_v27 = vadd.f32 %v2808_v23, %v2736_v43 }
 0x3c2   :  { %v2219_v33 = vpop.f32.mrf.mxu0 }
 0x3c3   :  { %v889_v35 = vadd.f32 %v2219_v33, %v1845_v3  ;;  %2244 = vmatprep.mubr.bf16.mxu1 %v926_v31  ;;  %2276 = vmatprep.mubr.bf16.mxu0 %v926_v31  ;;  %v916_v41 = vmax.f32 %v878_v34, 0.0  ;;  %v620_v31 = vadd.f32 %v2738_v44, %v2808_v23 }
 0x3c4   :  { %v880_v37 = vpop.f32.mrf.mxu0  ;;  %2245 = vmatmul.mubr.bf16.gmra.mxu1 %v927_v32  ;;  %2277 = vmatmul.mubr.bf16.gmra.mxu0 %v927_v32 }
 0x3c5   :  { %v881_v38 = vadd.f32 %v1845_v3, %v880_v37  ;;  %v919_v39 = vmax.f32 %v889_v35, 0.0  ;;  %v623_v37 = vadd.f32 %v2742_v46, %v2808_v23  ;;  %v622_v46 = vadd.f32 %v2808_v23, %v2748_v53 }
 0x3c6   :  { %v2222_v40 = vpop.f32.mrf.mxu0  ;;  %v628_v53 = vadd.f32 %v2754_v59, %v2808_v23  ;;  %v629_v59 = vadd.f32 %v2808_v23, %v2760_v62 }
 0x3c7   :  { %v917_v1 = vmax.f32 %v881_v38, 0.0  ;;  %v929_v6 = vpack.c.bf16 %v919_v39, %v918_v2  ;;  %v902_v10 = vadd.f32 %v2222_v40, %v1845_v3  ;;  %v621_v40 = vadd.f32 %v2808_v23, %v2744_v49 }
 0x3c8   :  { %v893_v4 = vpop.f32.mrf.mxu0  ;;  %v627_v49 = vadd.f32 %v2750_v54, %v2808_v23  ;;  %v626_v54 = vadd.f32 %v2808_v23, %v2756_v60  ;;  %v632_v60 = vadd.f32 %v2762_v63, %v2808_v23 }
 0x3c9   :  { %v928_v5 = vpack.c.bf16 %v917_v1, %v916_v41  ;;  %v894_v8 = vadd.f32 %v1845_v3, %v893_v4  ;;  %v922_v17 = vmax.f32 %v902_v10, 0.0 }
 0x3ca   :  { %v2223_v7 = vpop.f32.mrf.mxu0 }
 0x3cb   :  { %v905_v9 = vadd.f32 %v2223_v7, %v1845_v3  ;;  %2248 = vmatprep.mubr.bf16.mxu1 %v928_v5  ;;  %2280 = vmatprep.mubr.bf16.mxu0 %v928_v5  ;;  %v920_v14 = vmax.f32 %v894_v8, 0.0 }
 0x3cc   :  { %v896_v11 = vpop.f32.mrf.mxu0  ;;  %2249 = vmatmul.mubr.bf16.gmra.mxu1 %v929_v6  ;;  %2281 = vmatmul.mubr.bf16.gmra.mxu0 %v929_v6 }
 0x3cd   :  { %v897_v12 = vadd.f32 %v1845_v3, %v896_v11  ;;  %v923_v13 = vmax.f32 %v905_v9, 0.0  ;;  %v2778_v3 = vld [vmem:[%s3113_s4 + $0xb0] sm:$0xff]  }
 0x3ce   :  { %2322 = vmatprep.subr.bf16.mxu0 %v2778_v3 }
 0x3cf   :  { %v921_v15 = vmax.f32 %v897_v12, 0.0  ;;  %v931_v19 = vpack.c.bf16 %v923_v13, %v922_v17  ;;  %2323 = vmatpush3.bf16.msra.mxu0 %v2778_v3 }
 0x3d1   :  { %v930_v18 = vpack.c.bf16 %v921_v15, %v920_v14 }
 0x3d3   :  { %2252 = vmatprep.mubr.bf16.mxu1 %v930_v18  ;;  %2284 = vmatprep.mubr.bf16.mxu0 %v930_v18 }
 0x3d4   :  { %2253 = vmatmul.mubr.bf16.gmra.mxu1 %v931_v19  ;;  %2285 = vmatmul.mubr.bf16.gmra.mxu0 %v931_v19 }
 0x3d5   :  { %2304 = vmatprep.mubr.bf16.mxu1 %v2582_v16  ;;  %v2786_v16 = vld [vmem:[%s3113_s4 + $0xa8] sm:$0xff]  }
 0x3d6   :  { %2324 = vmatprep.subr.bf16.mxu0 %v2786_v16 }
 0x3d7   :  { %2325 = vmatpush3.bf16.msra.mxu0 %v2786_v16 }
 0x3d8   :  { %2326 = vmatprep.subr.bf16.mxu0 %v2793_v21 }
 0x3db   :  { %2327 = vmatpush3.bf16.msra.mxu0 %v2793_v21 }
 0x3dc   :  { %2328 = vmatprep.subr.bf16.mxu0 %v2800_v22 }
 0x3df   :  { %2329 = vmatpush3.bf16.msra.mxu0 %v2800_v22 }
 0x47c   :  { %v2242_v25 = vpop.f32.mrf.mxu1  ;;  %v2812_v26 = vpop.f32.mrf.mxu0 }
 0x47d   :  { %v2816_v28 = vadd.f32 %v2242_v25, %v619_v24 }
 0x47e   :  { %v1031_v29 = vpop.f32.mrf.mxu1  ;;  %v2818_v30 = vpop.f32.mrf.mxu0 }
 0x47f   :  { %v2822_v32 = vadd.f32 %v1031_v29, %v617_v27 }
 0x480   :  { %v2243_v33 = vpop.f32.mrf.mxu1  ;;  %v2824_v34 = vpop.f32.mrf.mxu0 }
 0x481   :  { %v2828_v35 = vadd.f32 %v2243_v33, %v620_v31 }
 0x482   :  { %v1034_v36 = vpop.f32.mrf.mxu1  ;;  %v2830_v43 = vpop.f32.mrf.mxu0 }
 0x483   :  { %v2834_v38 = vadd.f32 %v1034_v36, %v618_v42 }
 0x484   :  { %v2246_v39 = vpop.f32.mrf.mxu1  ;;  %v2278_v44 = vpop.f32.mrf.mxu0 }
 0x485   :  { %v2838_v41 = vadd.f32 %v2246_v39, %v623_v37 }
 0x486   :  { %v1047_v1 = vpop.f32.mrf.mxu1  ;;  %v1225_v2 = vpop.f32.mrf.mxu0 }
 0x487   :  { %v2842_v4 = vadd.f32 %v1047_v1, %v621_v40 }
 0x488   :  { %v2247_v5 = vpop.f32.mrf.mxu1  ;;  %v2279_v6 = vpop.f32.mrf.mxu0 }
 0x489   :  { %v2846_v7 = vadd.f32 %v2247_v5, %v624_v45 }
 0x48a   :  { %v1050_v8 = vpop.f32.mrf.mxu1  ;;  %v1228_v9 = vpop.f32.mrf.mxu0 }
 0x48b   :  { %v2850_v10 = vadd.f32 %v1050_v8, %v622_v46  ;;  %v1274_v63 = vpack.c.bf16 %v1228_v9, %v1225_v2 }
 0x48c   :  { %v2250_v11 = vpop.f32.mrf.mxu1  ;;  %v2282_v12 = vpop.f32.mrf.mxu0 }
 0x48d   :  { %v2854_v13 = vadd.f32 %v2250_v11, %v627_v49  ;;  %v1275_v49 = vpack.c.bf16 %v2279_v6, %v2278_v44  ;;  %v1273_v11 = vpack.c.bf16 %v2824_v34, %v2812_v26 }
 0x48e   :  { %v1063_v14 = vpop.f32.mrf.mxu1  ;;  %v1241_v15 = vpop.f32.mrf.mxu0 }
 0x48f   :  { %v2858_v17 = vadd.f32 %v1063_v14, %v625_v50  ;;  %v1272_v50 = vpack.c.bf16 %v2830_v43, %v2818_v30 }
 0x490   :  { %v2251_v18 = vpop.f32.mrf.mxu1  ;;  %v2283_v19 = vpop.f32.mrf.mxu0 }
 0x491   :  { %v2862_v24 = vadd.f32 %v2251_v18, %v628_v53  ;;  %v1277_v62 = vpack.c.bf16 %v2283_v19, %v2282_v12 }
 0x492   :  { %v1066_v25 = vpop.f32.mrf.mxu1  ;;  %v1244_v27 = vpop.f32.mrf.mxu0 }
 0x493   :  { %v2866_v29 = vadd.f32 %v1066_v25, %v626_v54  ;;  %v1276_v8 = vpack.c.bf16 %v1244_v27, %v1241_v15 }
 0x494   :  { %v2254_v31 = vpop.f32.mrf.mxu1  ;;  %v2286_v33 = vpop.f32.mrf.mxu0 }
 0x495   :  { %v2870_v42 = vadd.f32 %v2254_v31, %v631_v58 }
 0x496   :  { %v1079_v36 = vpop.f32.mrf.mxu1  ;;  %v1257_v37 = vpop.f32.mrf.mxu0 }
 0x497   :  { %v2874_v39 = vadd.f32 %v1079_v36, %v629_v59 }
 0x498   :  { %v2255_v40 = vpop.f32.mrf.mxu1  ;;  %v2287_v1 = vpop.f32.mrf.mxu0 }
 0x499   :  { %v2876_v45 = vadd.f32 %v2255_v40, %v632_v60  ;;  %v1279_v61 = vpack.c.bf16 %v2287_v1, %v2286_v33 }
 0x49a   :  { %v1260_v5 = vpop.f32.mrf.mxu0 }
 0x49b   :  { %v1278_v46 = vpack.c.bf16 %v1260_v5, %v1257_v37  ;;  %2288 = vmatprep.subr.bf16.mxu1 %v1279_v61 }
 0x49c   :  { %2289 = vmatpush3.bf16.msra.mxu1 %v1279_v61 }
 0x49d   :  { %2290 = vmatprep.subr.bf16.mxu1 %v1278_v46 }
 0x4a0   :  { %2291 = vmatpush3.bf16.msra.mxu1 %v1278_v46 }
 0x4a1   :  { %2292 = vmatprep.subr.bf16.mxu1 %v1277_v62 }
 0x4a4   :  { %2293 = vmatpush3.bf16.msra.mxu1 %v1277_v62 }
 0x4a5   :  { %2294 = vmatprep.subr.bf16.mxu1 %v1276_v8 }
 0x4a8   :  { %2295 = vmatpush3.bf16.msra.mxu1 %v1276_v8 }
 0x4a9   :  { %2296 = vmatprep.subr.bf16.mxu1 %v1275_v49 }
 0x4ac   :  { %2297 = vmatpush3.bf16.msra.mxu1 %v1275_v49 }
 0x4ad   :  { %2298 = vmatprep.subr.bf16.mxu1 %v1274_v63 }
 0x4b0   :  { %2299 = vmatpush3.bf16.msra.mxu1 %v1274_v63 }
 0x4b1   :  { %2300 = vmatprep.subr.bf16.mxu1 %v1273_v11 }
 0x4b4   :  { %2301 = vmatpush3.bf16.msra.mxu1 %v1273_v11 }
 0x4b5   :  { %2302 = vmatprep.subr.bf16.mxu1 %v1272_v50 }
 0x4b8   :  { %2303 = vmatpush3.bf16.msra.mxu1 %v1272_v50 }
 0x4b9   :  { %2352 = vmatprep.subr.bf16.mxu1 %v2773_v20 }
 0x4bb   :  { %2305 = vmatmul.mubr.bf16.vlgmr.msra.gmra.mxu1 %v2606_v47  ;;  %v2429_v47 = vld [vmem:[%s3113_s4 + $0x90] sm:$0xff]  }
 0x4bc   :  { %2308 = vmatprep.mubr.bf16.mxu1 %v2611_v48  ;;  %2360 = vmatpush3.bf16.msra.mxu1 %v2773_v20  ;;  %v2430_v48 = vld [vmem:[%s3113_s4 + $0x88] sm:$0xff]  }
 0x4bd   :  { %2353 = vmatprep.subr.bf16.mxu1 %v2778_v3  ;;  %2330 = vmatprep.subr.bf16.mxu0 %v2429_v47 }
 0x4be   :  { %2331 = vmatpush3.bf16.msra.mxu0 %v2429_v47 }
 0x4bf   :  { %2332 = vmatprep.subr.bf16.mxu0 %v2430_v48 }
 0x4c0   :  { %2361 = vmatpush3.bf16.msra.mxu1 %v2778_v3 }
 0x4c1   :  { %2354 = vmatprep.subr.bf16.mxu1 %v2786_v16 }
 0x4c2   :  { %2333 = vmatpush3.bf16.msra.mxu0 %v2430_v48 }
 0x4c3   :  { %2309 = vmatmul.mubr.bf16.gmra.mxu1 %v2624_v51  ;;  %v2431_v51 = vld [vmem:[%s3113_s4 + $0x80] sm:$0xff]  }
 0x4c4   :  { %2312 = vmatprep.mubr.bf16.mxu1 %v2629_v52  ;;  %2362 = vmatpush3.bf16.msra.mxu1 %v2786_v16  ;;  %v2908_v52 = vpop.f32.mrf.mxu1 }
 0x4c5   :  { %2355 = vmatprep.subr.bf16.mxu1 %v2793_v21  ;;  %2334 = vmatprep.subr.bf16.mxu0 %v2431_v51 }
 0x4c6   :  { %2335 = vmatpush3.bf16.msra.mxu0 %v2431_v51 }
 0x4c8   :  { %2363 = vmatpush3.bf16.msra.mxu1 %v2793_v21 }
 0x4c9   :  { %2356 = vmatprep.subr.bf16.mxu1 %v2800_v22 }
 0x4cb   :  { %2313 = vmatmul.mubr.bf16.gmra.mxu1 %v2642_v55 }
 0x4cc   :  { %2316 = vmatprep.mubr.bf16.mxu1 %v2647_v56  ;;  %2364 = vmatpush3.bf16.msra.mxu1 %v2800_v22 }
 0x4cd   :  { %2357 = vmatprep.subr.bf16.mxu1 %v2429_v47 }
 0x4d0   :  { %2365 = vmatpush3.bf16.msra.mxu1 %v2429_v47 }
 0x4d1   :  { %2358 = vmatprep.subr.bf16.mxu1 %v2430_v48 }
 0x4d3   :  { %2317 = vmatmul.mubr.bf16.gmra.mxu1 %v2654_v57  ;;  %v1895_v57 = vld [vmem:[%s3114_s3 + $0x2] ss:$0 sm:$0xff] }
 0x4d4   :  { %2366 = vmatpush3.bf16.msra.mxu1 %v2430_v48 }
 0x4d5   :  { %2359 = vmatprep.subr.bf16.mxu1 %v2431_v51 }
 0x4d8   :  { %2367 = vmatpush3.bf16.msra.mxu1 %v2431_v51 }
 0x57b   :  { %v2306_v55 = vpop.f32.mrf.mxu1 }
 0x57c   :  { %v1331_v21 = vadd.f32 %v2306_v55, %v1895_v57 }
 0x57d   :  { %v1322_v56 = vpop.f32.mrf.mxu1 }
 0x57e   :  { %v1323_v3 = vadd.f32 %v1895_v57, %v1322_v56  ;;  %v1387_v2 = vmax.f32 %v1331_v21, 0.0 }
 0x57f   :  { %v2307_v20 = vpop.f32.mrf.mxu1 }
 0x580   :  { %v1334_v16 = vadd.f32 %v2307_v20, %v1895_v57  ;;  %v1385_v43 = vmax.f32 %v1323_v3, 0.0 }
 0x581   :  { %v1325_v22 = vpop.f32.mrf.mxu1 }
 0x582   :  { %v1326_v26 = vadd.f32 %v1895_v57, %v1325_v22  ;;  %v1388_v30 = vmax.f32 %v1334_v16, 0.0 }
 0x583   :  { %v2310_v34 = vpop.f32.mrf.mxu1 }
 0x584   :  { %v1386_v44 = vmax.f32 %v1326_v26, 0.0  ;;  %v1402_v12 = vpack.c.bf16 %v1388_v30, %v1387_v2  ;;  %v1347_v18 = vadd.f32 %v2310_v34, %v1895_v57 }
 0x585   :  { %v1338_v6 = vpop.f32.mrf.mxu1 }
 0x586   :  { %v1401_v9 = vpack.c.bf16 %v1386_v44, %v1385_v43  ;;  %v1339_v15 = vadd.f32 %v1895_v57, %v1338_v6  ;;  %v1391_v33 = vmax.f32 %v1347_v18, 0.0  ;;  %v1587_v44 = vlaneseq }
 0x587   :  { %v2311_v14 = vpop.f32.mrf.mxu1 }
 0x588   :  { %v1350_v53 = vadd.f32 %v2311_v14, %v1895_v57  ;;  %2336 = vmatprep.mubr.bf16.mxu0 %v1401_v9  ;;  %v1389_v58 = vmax.f32 %v1339_v15, 0.0  ;;  %v2913_v2 = vand.u32 127, %v1587_v44 }
 0x589   :  { %v1341_v19 = vpop.f32.mrf.mxu1  ;;  %2337 = vmatmul.mubr.bf16.vlgmr.msra.gmra.mxu0 %v1402_v12 }
 0x58a   :  { %v1342_v54 = vadd.f32 %v1895_v57, %v1341_v19  ;;  %v1392_v25 = vmax.f32 %v1350_v53, 0.0  ;;  %vm1589_vm0 = vcmp.lt.s32.totalorder %v2913_v2, 4 }
 0x58b   :  { %v2314_v27 = vpop.f32.mrf.mxu1 }
 0x58c   :  { %v1390_v31 = vmax.f32 %v1342_v54, 0.0  ;;  %v1404_v37 = vpack.c.bf16 %v1392_v25, %v1391_v33  ;;  %v1363_v61 = vadd.f32 %v2314_v27, %v1895_v57 }
 0x58d   :  { %v1354_v59 = vpop.f32.mrf.mxu1 }
 0x58e   :  { %v1403_v36 = vpack.c.bf16 %v1390_v31, %v1389_v58  ;;  %v1355_v40 = vadd.f32 %v1895_v57, %v1354_v59  ;;  %v1395_v11 = vmax.f32 %v1363_v61, 0.0 }
 0x58f   :  { %v2315_v60 = vpop.f32.mrf.mxu1 }
 0x590   :  { %v1366_v1 = vadd.f32 %v2315_v60, %v1895_v57  ;;  %2340 = vmatprep.mubr.bf16.mxu0 %v1403_v36  ;;  %v1393_v49 = vmax.f32 %v1355_v40, 0.0 }
 0x591   :  { %v1357_v5 = vpop.f32.mrf.mxu1  ;;  %2341 = vmatmul.mubr.bf16.gmra.mxu0 %v1404_v37 }
 0x592   :  { %v1358_v46 = vadd.f32 %v1895_v57, %v1357_v5  ;;  %v1396_v62 = vmax.f32 %v1366_v1, 0.0 }
 0x593   :  { %v2318_v8 = vpop.f32.mrf.mxu1 }
 0x594   :  { %v1394_v63 = vmax.f32 %v1358_v46, 0.0  ;;  %v1406_v48 = vpack.c.bf16 %v1396_v62, %v1395_v11  ;;  %v1379_v20 = vadd.f32 %v2318_v8, %v1895_v57 }
 0x595   :  { %v1370_v50 = vpop.f32.mrf.mxu1 }
 0x596   :  { %v1405_v47 = vpack.c.bf16 %v1394_v63, %v1393_v49  ;;  %v1371_v55 = vadd.f32 %v1895_v57, %v1370_v50  ;;  %v1399_v30 = vmax.f32 %v1379_v20, 0.0 }
 0x597   :  { %v2319_v51 = vpop.f32.mrf.mxu1 }
 0x598   :  { %v1382_v56 = vadd.f32 %v2319_v51, %v1895_v57  ;;  %2344 = vmatprep.mubr.bf16.mxu1 %v1405_v47  ;;  %v1397_v22 = vmax.f32 %v1371_v55, 0.0 }
 0x599   :  { %v1373_v3 = vpop.f32.mrf.mxu1  ;;  %2345 = vmatmul.mubr.bf16.vlgmr.msra.gmra.mxu1 %v1406_v48 }
 0x59a   :  { %v1374_v16 = vadd.f32 %v1895_v57, %v1373_v3  ;;  %v1400_v21 = vmax.f32 %v1382_v56, 0.0 }
 0x59c   :  { %v1398_v26 = vmax.f32 %v1374_v16, 0.0  ;;  %v1408_v43 = vpack.c.bf16 %v1400_v21, %v1399_v30 }
 0x59e   :  { %v1407_v34 = vpack.c.bf16 %v1398_v26, %v1397_v22 }
 0x5a0   :  { %2348 = vmatprep.mubr.bf16.mxu1 %v1407_v34 }
 0x5a1   :  { %2349 = vmatmul.mubr.bf16.gmra.mxu1 %v1408_v43 }
 0x649   :  { %v2338_v6 = vpop.f32.mrf.mxu0 }
 0x64a   :  { %v1573_v9 = vadd.f32 %v2338_v6, %v2816_v28 }
 0x64b   :  { %v1508_v12 = vpop.f32.mrf.mxu0 }
 0x64c   :  { %v1571_v14 = vadd.f32 %v1508_v12, %v2822_v32  ;;  %v2920_v57 = vsel %vm1589_vm0, %v1573_v9, -1e+30 }
 0x64d   :  { %1610 = vmax.xlane.f32.xlu1 %v2920_v57  ;;  %v2339_v15 = vpop.f32.mrf.mxu0 }
 0x64e   :  { %v1574_v53 = vadd.f32 %v2339_v15, %v2828_v35  ;;  %v1590_v18 = vsel %vm1589_vm0, %v1571_v14, -1e+30 }
 0x64f   :  { %1606 = vmax.xlane.f32.xlu0 %v1590_v18  ;;  %v1511_v19 = vpop.f32.mrf.mxu0 }
 0x650   :  { %v1572_v54 = vadd.f32 %v1511_v19, %v2834_v38  ;;  %v1593_v28 = vsel %vm1589_vm0, %v1574_v53, -1e+30 }
 0x651   :  { %1612 = vmax.xlane.f32.xlu1 %v1593_v28  ;;  %v2342_v32 = vpop.f32.mrf.mxu0 }
 0x652   :  { %v1577_v25 = vadd.f32 %v2342_v32, %v2838_v41  ;;  %v1591_v27 = vsel %vm1589_vm0, %v1572_v54, -1e+30 }
 0x653   :  { %1608 = vmax.xlane.f32.xlu0 %v1591_v27  ;;  %v1524_v58 = vpop.f32.mrf.mxu0 }
 0x654   :  { %v1575_v31 = vadd.f32 %v1524_v58, %v2842_v4  ;;  %v1596_v38 = vsel %vm1589_vm0, %v1577_v25, -1e+30 }
 0x655   :  { %v2343_v35 = vpop.f32.mrf.mxu0 }
 0x656   :  { %v1578_v33 = vadd.f32 %v2343_v35, %v2846_v7  ;;  %v1594_v40 = vsel %vm1589_vm0, %v1575_v31, -1e+30 }
 0x657   :  { %1618 = vmax.xlane.f32.xlu0 %v1596_v38  ;;  %v1527_v59 = vpop.f32.mrf.mxu0 }
 0x658   :  { %v1576_v36 = vadd.f32 %v1527_v59, %v2850_v10  ;;  %v1597_v41 = vsel %vm1589_vm0, %v1578_v33, -1e+30 }
 0x659   :  { %v2346_v37 = vpop.f32.mrf.mxu1  ;;  %1620 = vmax.xlane.f32.xlu1 %v1597_v41 }
 0x65a   :  { %v1581_v60 = vadd.f32 %v2346_v37, %v2854_v13  ;;  %v1595_v7 = vsel %vm1589_vm0, %v1576_v36, -1e+30 }
 0x65b   :  { %v1540_v4 = vpop.f32.mrf.mxu1  ;;  %1614 = vmax.xlane.f32.xlu0 %v1594_v40 }
 0x65c   :  { %v1579_v61 = vadd.f32 %v1540_v4, %v2858_v17  ;;  %v1600_v5 = vsel %vm1589_vm0, %v1581_v60, -1e+30 }
 0x65d   :  { %v2347_v1 = vpop.f32.mrf.mxu1  ;;  %1616 = vmax.xlane.f32.xlu1 %v1595_v7 }
 0x65e   :  { %v1582_v10 = vadd.f32 %v2347_v1, %v2862_v24  ;;  %v2956_v49 = vsel %vm1589_vm0, %v1579_v61, -1e+30  ;;  %v630_v24 = vadd.f32 %v2808_v23, %v2764_v0 }
 0x65f   :  { %v1543_v46 = vpop.f32.mrf.mxu1  ;;  %1626 = vmax.xlane.f32.xlu0 %v1600_v5 }
 0x660   :  { %v1580_v13 = vadd.f32 %v1543_v46, %v2866_v29  ;;  %v2951_v62 = vsel %vm1589_vm0, %v1582_v10, -1e+30  ;;  %v1107_v50 = vadd.f32 %v2908_v52, %v630_v24 }
 0x661   :  { %v2350_v8 = vpop.f32.mrf.mxu1  ;;  %1628 = vmax.xlane.f32.xlu1 %v2951_v62 }
 0x662   :  { %v2964_v29 = vsel %vm1589_vm0, %v1580_v13, -1e+30  ;;  %v1585_v47 = vadd.f32 %v2350_v8, %v2870_v42 }
 0x663   :  { %v1556_v17 = vpop.f32.mrf.mxu1  ;;  %1622 = vmax.xlane.f32.xlu0 %v2956_v49 }
 0x664   :  { %v1583_v63 = vadd.f32 %v1556_v17, %v2874_v39  ;;  %v2977_v39 = vsel %vm1589_vm0, %v1585_v47, -1e+30 }
 0x665   :  { %v2351_v11 = vpop.f32.mrf.mxu1  ;;  %1624 = vmax.xlane.f32.xlu1 %v2964_v29 }
 0x666   :  { %v2971_v48 = vsel %vm1589_vm0, %v1583_v63, -1e+30  ;;  %v1586_v23 = vadd.f32 %v2351_v11, %v2876_v45 }
 0x667   :  { %v1559_v51 = vpop.f32.mrf.mxu1  ;;  %1630 = vmax.xlane.f32.xlu0 %v2971_v48 }
 0x668   :  { %v1584_v0 = vadd.f32 %v1559_v51, %v1107_v50  ;;  %v2987_v42 = vsel %vm1589_vm0, %v1586_v23, -1e+30 }
 0x66a   :  { %v2981_v55 = vsel %vm1589_vm0, %v1584_v0, -1e+30 }
 0x66b   :  { %1634 = vmax.xlane.f32.xlu0 %v2977_v39  ;;  %1632 = vmax.xlane.f32.xlu1 %v2981_v55 }
 0x66f   :  { %1636 = vmax.xlane.f32.xlu1 %v2987_v42 }
 0x6d6   :  { %v1611_v52 = vpop.xlane.xlu1 %1610 }
 0x6d7   :  { %v2991_v45 = vsub.f32 %v2920_v57, %v1611_v52 }
 0x6d8   :  { %v1607_v56 = vpop.xlane.xlu0 %1606 }
 0x6d9   :  { %v1658_v20 = vmul.f32 1.442695, %v2991_v45  ;;  %v2994_v3 = vsub.f32 %v1590_v18, %v1607_v56 }
 0x6da   :  { %v1613_v16 = vpop.xlane.xlu1 %1612 }
 0x6db   :  { %2432 = vpow2.f32 %v1658_v20  ;;  %v1654_v21 = vmul.f32 1.442695, %v2994_v3  ;;  %v2997_v22 = vsub.f32 %v1593_v28, %v1613_v16 }
 0x6dc   :  { %v1609_v26 = vpop.xlane.xlu0 %1608 }
 0x6dd   :  { %v1660_v30 = vmul.f32 1.442695, %v2997_v22  ;;  %v3000_v34 = vsub.f32 %v1591_v27, %v1609_v26  ;;  %2434 = vpow2.f32 %v1654_v21 }
 0x6df   :  { %2436 = vpow2.f32 %v1660_v30  ;;  %v1656_v43 = vmul.f32 1.442695, %v3000_v34 }
 0x6e0   :  { %v1619_v44 = vpop.xlane.xlu0 %1618 }
 0x6e1   :  { %v3003_v2 = vsub.f32 %v1596_v38, %v1619_v44  ;;  %2438 = vpow2.f32 %v1656_v43 }
 0x6e2   :  { %v1621_v6 = vpop.xlane.xlu1 %1620 }
 0x6e3   :  { %v1666_v9 = vmul.f32 1.442695, %v3003_v2  ;;  %v3006_v12 = vsub.f32 %v1597_v41, %v1621_v6 }
 0x6e4   :  { %v1615_v14 = vpop.xlane.xlu0 %1614 }
 0x6e5   :  { %2440 = vpow2.f32 %v1666_v9  ;;  %v1668_v57 = vmul.f32 1.442695, %v3006_v12  ;;  %v3009_v15 = vsub.f32 %v1594_v40, %v1615_v14 }
 0x6e6   :  { %v1617_v53 = vpop.xlane.xlu1 %1616 }
 0x6e7   :  { %2442 = vpow2.f32 %v1668_v57  ;;  %v1662_v18 = vmul.f32 1.442695, %v3009_v15  ;;  %v3012_v19 = vsub.f32 %v1595_v7, %v1617_v53 }
 0x6e8   :  { %v2433_v54 = vpop.eup %2432  ;;  %v1627_v28 = vpop.xlane.xlu0 %1626 }
 0x6e9   :  { %2444 = vpow2.f32 %v1662_v18  ;;  %v1664_v32 = vmul.f32 1.442695, %v3012_v19  ;;  %v3015_v25 = vsub.f32 %v1600_v5, %v1627_v28  ;;  %1690 = vadd.xlane.f32.xlu0 %v2433_v54 }
 0x6ea   :  { %v1629_v27 = vpop.xlane.xlu1 %1628  ;;  %v2435_v58 = vpop.eup %2434 }
 0x6eb   :  { %2446 = vpow2.f32 %v1664_v32  ;;  %v1674_v35 = vmul.f32 1.442695, %v3015_v25  ;;  %v3019_v31 = vsub.f32 %v2951_v62, %v1629_v27 }
 0x6ec   :  { %v2437_v33 = vpop.eup %2436  ;;  %v1623_v38 = vpop.xlane.xlu0 %1622 }
 0x6ed   :  { %2448 = vpow2.f32 %v1674_v35  ;;  %v1676_v59 = vmul.f32 1.442695, %v3019_v31  ;;  %v3023_v36 = vsub.f32 %v2956_v49, %v1623_v38  ;;  %1686 = vadd.xlane.f32.xlu0 %v2435_v58  ;;  %1692 = vadd.xlane.f32.xlu1 %v2437_v33 }
 0x6ee   :  { %v1625_v41 = vpop.xlane.xlu1 %1624  ;;  %v2439_v40 = vpop.eup %2438 }
 0x6ef   :  { %2450 = vpow2.f32 %v1676_v59  ;;  %v1670_v37 = vmul.f32 1.442695, %v3023_v36  ;;  %v3027_v60 = vsub.f32 %v2964_v29, %v1625_v41 }
 0x6f0   :  { %v1631_v4 = vpop.xlane.xlu0 %1630 }
 0x6f1   :  { %2452 = vpow2.f32 %v1670_v37  ;;  %v1672_v7 = vmul.f32 1.442695, %v3027_v60  ;;  %v3031_v1 = vsub.f32 %v2971_v48, %v1631_v4  ;;  %1688 = vadd.xlane.f32.xlu1 %v2439_v40 }
 0x6f2   :  { %v2441_v61 = vpop.eup %2440 }
 0x6f3   :  { %2454 = vpow2.f32 %v1672_v7  ;;  %v1678_v10 = vmul.f32 1.442695, %v3031_v1  ;;  %1698 = vadd.xlane.f32.xlu0 %v2441_v61 }
 0x6f4   :  { %v2443_v5 = vpop.eup %2442  ;;  %v1635_v46 = vpop.xlane.xlu0 %1634 }
 0x6f5   :  { %v1633_v13 = vpop.xlane.xlu1 %1632  ;;  %2456 = vpow2.f32 %v1678_v10  ;;  %v3035_v62 = vsub.f32 %v2977_v39, %v1635_v46  ;;  %1700 = vadd.xlane.f32.xlu1 %v2443_v5 }
 0x6f6   :  { %v3038_v8 = vsub.f32 %v2981_v55, %v1633_v13  ;;  %v2445_v49 = vpop.eup %2444 }
 0x6f7   :  { %v1682_v17 = vmul.f32 1.442695, %v3035_v62  ;;  %1694 = vadd.xlane.f32.xlu0 %v2445_v49 }
 0x6f8   :  { %v1680_v24 = vmul.f32 1.442695, %v3038_v8  ;;  %v2447_v63 = vpop.eup %2446 }
 0x6f9   :  { %v1637_v29 = vpop.xlane.xlu1 %1636  ;;  %2458 = vpow2.f32 %v1682_v17  ;;  %1696 = vadd.xlane.f32.xlu1 %v2447_v63 }
 0x6fa   :  { %v3043_v11 = vsub.f32 %v2987_v42, %v1637_v29  ;;  %v2449_v50 = vpop.eup %2448  ;;  %2460 = vpow2.f32 %v1680_v24 }
 0x6fb   :  { %1706 = vadd.xlane.f32.xlu0 %v2449_v50 }
 0x6fc   :  { %v1684_v47 = vmul.f32 1.442695, %v3043_v11  ;;  %v2451_v48 = vpop.eup %2450 }
 0x6fd   :  { %1708 = vadd.xlane.f32.xlu1 %v2451_v48 }
 0x6fe   :  { %2462 = vpow2.f32 %v1684_v47  ;;  %v2453_v51 = vpop.eup %2452 }
 0x6ff   :  { %1702 = vadd.xlane.f32.xlu0 %v2453_v51 }
 0x700   :  { %v2455_v0 = vpop.eup %2454 }
 0x701   :  { %1704 = vadd.xlane.f32.xlu1 %v2455_v0 }
 0x702   :  { %v2457_v23 = vpop.eup %2456 }
 0x703   :  { %1710 = vadd.xlane.f32.xlu0 %v2457_v23 }
 0x706   :  { %v2459_v39 = vpop.eup %2458 }
 0x707   :  { %v2461_v55 = vpop.eup %2460  ;;  %1714 = vadd.xlane.f32.xlu0 %v2459_v39 }
 0x708   :  { %1712 = vadd.xlane.f32.xlu1 %v2461_v55 }
 0x70b   :  { %v2463_v42 = vpop.eup %2462 }
 0x70c   :  { %1716 = vadd.xlane.f32.xlu1 %v2463_v42 }
 0x772   :  { %v1691_v52 = vpop.xlane.xlu0 %1690 }
 0x773   :  { %2464 = vlog2.f32 %v1691_v52 }
 0x776   :  { %v1687_v56 = vpop.xlane.xlu0 %1686  ;;  %v1693_v20 = vpop.xlane.xlu1 %1692 }
 0x777   :  { %2466 = vlog2.f32 %v1687_v56 }
 0x778   :  { %2468 = vlog2.f32 %v1693_v20 }
 0x77a   :  { %v1689_v16 = vpop.xlane.xlu1 %1688 }
 0x77b   :  { %2470 = vlog2.f32 %v1689_v16 }
 0x77c   :  { %v1699_v21 = vpop.xlane.xlu0 %1698 }
 0x77d   :  { %2472 = vlog2.f32 %v1699_v21 }
 0x77e   :  { %v1701_v26 = vpop.xlane.xlu1 %1700 }
 0x77f   :  { %2474 = vlog2.f32 %v1701_v26 }
 0x780   :  { %v2465_v30 = vpop.eup %2464  ;;  %v1695_v43 = vpop.xlane.xlu0 %1694 }
 0x781   :  { %v1723_v44 = vmul.f32 0.6931472, %v2465_v30  ;;  %2476 = vlog2.f32 %v1695_v43 }
 0x782   :  { %v1697_v6 = vpop.xlane.xlu1 %1696 }
 0x783   :  { %v1752_v9 = vsub.f32 %v2991_v45, %v1723_v44  ;;  %2478 = vlog2.f32 %v1697_v6 }
 0x784   :  { %v2467_v14 = vpop.eup %2466  ;;  %v1707_v57 = vpop.xlane.xlu0 %1706 }
 0x785   :  { %v2469_v53 = vpop.eup %2468  ;;  %1768 = vst [vmem:[%s3116_s6 + $0x10] sm:$0xff] %v1752_v9  ;;  %v1719_v18 = vmul.f32 0.6931472, %v2467_v14  ;;  %2480 = vlog2.f32 %v1707_v57 }
 0x786   :  { %v1725_v54 = vmul.f32 0.6931472, %v2469_v53  ;;  %v1709_v28 = vpop.xlane.xlu1 %1708 }
 0x787   :  { %v1750_v32 = vsub.f32 %v2994_v3, %v1719_v18  ;;  %2482 = vlog2.f32 %v1709_v28 }
 0x788   :  { %v2471_v27 = vpop.eup %2470  ;;  %v1753_v58 = vsub.f32 %v2997_v22, %v1725_v54  ;;  %v1703_v35 = vpop.xlane.xlu0 %1702 }
 0x789   :  { %1766 = vst [vmem:[%s3116_s6] sm:$0xff] %v1750_v32  ;;  %v1721_v45 = vmul.f32 0.6931472, %v2471_v27  ;;  %2484 = vlog2.f32 %v1703_v35 }
 0x78a   :  { %v2473_v33 = vpop.eup %2472  ;;  %1769 = vst [vmem:[%s3116_s6 + $0x18] sm:$0xff] %v1753_v58  ;;  %v1705_v38 = vpop.xlane.xlu1 %1704 }
 0x78b   :  { %v1751_v59 = vsub.f32 %v3000_v34, %v1721_v45  ;;  %v1731_v3 = vmul.f32 0.6931472, %v2473_v33  ;;  %2486 = vlog2.f32 %v1705_v38 }
 0x78c   :  { %v2475_v41 = vpop.eup %2474  ;;  %v1711_v37 = vpop.xlane.xlu0 %1710 }
 0x78d   :  { %1767 = vst [vmem:[%s3116_s6 + $0x8] sm:$0xff] %v1751_v59  ;;  %v1756_v22 = vsub.f32 %v3003_v2, %v1731_v3  ;;  %v1733_v40 = vmul.f32 0.6931472, %v2475_v41  ;;  %2488 = vlog2.f32 %v1711_v37 }
 0x78e   :  { %v2477_v4 = vpop.eup %2476 }
 0x78f   :  { %1772 = vst [vmem:[%s3116_s6 + $0x30] sm:$0xff] %v1756_v22  ;;  %v1757_v7 = vsub.f32 %v3006_v12, %v1733_v40  ;;  %v1727_v34 = vmul.f32 0.6931472, %v2477_v4 }
 0x790   :  { %v2479_v61 = vpop.eup %2478  ;;  %v1715_v10 = vpop.xlane.xlu0 %1714 }
 0x791   :  { %1773 = vst [vmem:[%s3116_s6 + $0x38] sm:$0xff] %v1757_v7  ;;  %v1754_v5 = vsub.f32 %v3009_v15, %v1727_v34  ;;  %v1729_v46 = vmul.f32 0.6931472, %v2479_v61  ;;  %2490 = vlog2.f32 %v1715_v10  ;;  %v1713_v2 = vpop.xlane.xlu1 %1712 }
 0x792   :  { %v2481_v13 = vpop.eup %2480  ;;  %2492 = vlog2.f32 %v1713_v2 }
 0x793   :  { %1770 = vst [vmem:[%s3116_s6 + $0x20] sm:$0xff] %v1754_v5  ;;  %v1755_v12 = vsub.f32 %v3012_v19, %v1729_v46  ;;  %v1739_v49 = vmul.f32 0.6931472, %v2481_v13 }
 0x794   :  { %v2483_v17 = vpop.eup %2482 }
 0x795   :  { %1771 = vst [vmem:[%s3116_s6 + $0x28] sm:$0xff] %v1755_v12  ;;  %v1760_v24 = vsub.f32 %v3015_v25, %v1739_v49  ;;  %v1741_v15 = vmul.f32 0.6931472, %v2483_v17  ;;  %v1717_v63 = vpop.xlane.xlu1 %1716 }
 0x796   :  { %v2485_v29 = vpop.eup %2484  ;;  %2494 = vlog2.f32 %v1717_v63 }
 0x797   :  { %1776 = vst [vmem:[%s3116_s6 + $0x50] sm:$0xff] %v1760_v24  ;;  %v1761_v50 = vsub.f32 %v3019_v31, %v1741_v15  ;;  %v1735_v47 = vmul.f32 0.6931472, %v2485_v29 }
 0x798   :  { %v2487_v19 = vpop.eup %2486 }
 0x799   :  { %1777 = vst [vmem:[%s3116_s6 + $0x58] sm:$0xff] %v1761_v50  ;;  %v1758_v48 = vsub.f32 %v3023_v36, %v1735_v47  ;;  %v1737_v51 = vmul.f32 0.6931472, %v2487_v19 }
 0x79a   :  { %v2489_v25 = vpop.eup %2488 }
 0x79b   :  { %1774 = vst [vmem:[%s3116_s6 + $0x40] sm:$0xff] %v1758_v48  ;;  %v1759_v0 = vsub.f32 %v3027_v60, %v1737_v51  ;;  %v1743_v23 = vmul.f32 0.6931472, %v2489_v25 }
 0x79d   :  { %1775 = vst [vmem:[%s3116_s6 + $0x48] sm:$0xff] %v1759_v0  ;;  %v1762_v31 = vsub.f32 %v3031_v1, %v1743_v23 }
 0x79e   :  { %v2491_v39 = vpop.eup %2490 }
 0x79f   :  { %v2493_v55 = vpop.eup %2492  ;;  %1778 = vst [vmem:[%s3116_s6 + $0x60] sm:$0xff] %v1762_v31  ;;  %v1747_v36 = vmul.f32 0.6931472, %v2491_v39 }
 0x7a0   :  { %v1745_v42 = vmul.f32 0.6931472, %v2493_v55 }
 0x7a1   :  { %v1764_v52 = vsub.f32 %v3035_v62, %v1747_v36 }
 0x7a2   :  { %v1763_v56 = vsub.f32 %v3038_v8, %v1745_v42 }
 0x7a3   :  { %v2495_v60 = vpop.eup %2494  ;;  %1780 = vst [vmem:[%s3116_s6 + $0x70] sm:$0xff] %v1764_v52 }
 0x7a4   :  { %1779 = vst [vmem:[%s3116_s6 + $0x68] sm:$0xff] %v1763_v56  ;;  %v1749_v1 = vmul.f32 0.6931472, %v2495_v60 }
 0x7a6   :  { %v1765_v20 = vsub.f32 %v3043_v11, %v1749_v1 }
 0x7a8   :  { %1781 = vst [vmem:[%s3116_s6 + $0x78] sm:$0xff] %v1765_v20 }

</bundles_post_ra>
